<compile_context>
chip_gen: v5e
topology: v5e:2x2
jax: 0.10.0
libtpu: 0.0.40
codegen_flags: <defaults>
</compile_context>

<pallas_src>
import functools

import jax
import jax.numpy as jnp
import numpy as np
from jax.experimental import pallas as pl
from jax.experimental.pallas import tpu as pltpu


def _tensorcores_per_device():
    """Best-effort TC-per-device count; any answer is correct, only perf differs."""
    try:
        kind = jax.devices()[0].device_kind.lower()
    except Exception:
        return 1
    if "lite" in kind or "v5e" in kind or "v6e" in kind:
        return 1
    if "v7" in kind or "v4" in kind or "v5p" in kind:
        return 2
    return 1


def _embedding_kernel(tok_ids_ref,       # SMEM  (B*T,) int32   (scalar prefetch)
                      tok_emb_hbm,       # HBM   (V, D)         (pl.ANY, manual DMA)
                      pos_ref,           # VMEM  (T, D)         (resident block)
                      out_ref,           # VMEM  (T, D) block of (B, T, D) output
                      row_buf,           # VMEM  (2, T, D) double-buffered landing
                      sems,              # DMA semaphores (2,)  (one per slot)
                      *, seq_len, vocab, steps_per_group):
    g = pl.program_id(0)                 # batch group (parallel across cores)
    s = pl.program_id(1)                 # step within group (arbitrary / sequential)
    group_base = g * steps_per_group     # first batch element of this group

    def issue_wave(batch_idx, slot):
        # One small (1, D) row DMA per token, all issued back-to-back (unrolled so
        # descriptor issue stays ~1/bundle).  All SMEM reads happen before any wait.
        base = batch_idx * seq_len
        for r in range(seq_len):
            tok = tok_ids_ref[base + r]
            tok = jnp.minimum(jnp.maximum(tok, 0), vocab - 1)   # gather-style clamp
            pltpu.make_async_copy(
                tok_emb_hbm.at[pl.ds(tok, 1)],                  # (1, D) table row
                row_buf.at[slot, pl.ds(r, 1)],                  # (1, D) tile row
                sems.at[slot],
            ).start()

    # Prime this group's first wave (fires once per group on whichever core owns
    # it, so the pattern is safe when the parallel axis is split across cores).
    @pl.when(s == 0)
    def _():
        issue_wave(group_base, 0)

    # Prefetch the NEXT batch element's rows into the other slot before waiting on
    # the current slot; its HBM latency hides behind this step.
    if steps_per_group > 1:
        @pl.when(s + 1 < steps_per_group)
        def _():
            issue_wave(group_base + s + 1, (s + 1) % 2)

    # Wait for the current slot's wave (per-copy waits on the shared slot sem).
    slot = s % 2
    for r in range(seq_len):
        pltpu.make_async_copy(
            tok_emb_hbm.at[pl.ds(0, 1)],
            row_buf.at[slot, pl.ds(r, 1)],
            sems.at[slot],
        ).wait()

    # Fused position-embedding add; single lane-dense (T, D) store.
    out_ref[...] = (row_buf[slot] + pos_ref[...]).astype(out_ref.dtype)


def clip_embedding_pallas(tokens, tok_emb, pos_emb):
    """tokens: (B, T) int32; tok_emb: (V, D); pos_emb: (T, D) -> (B, T, D)."""
    B, T = tokens.shape
    V, D = tok_emb.shape
    assert pos_emb.shape == (T, D)
    assert D % 128 == 0, "embedding dim must be lane-aligned (multiple of 128)"

    n_cores = _tensorcores_per_device()
    n_groups = n_cores if (n_cores > 1 and B % n_cores == 0 and B >= n_cores) else 1
    steps = B // n_groups

    kernel = functools.partial(_embedding_kernel, seq_len=T, vocab=V,
                               steps_per_group=steps)
    grid_spec = pltpu.PrefetchScalarGridSpec(
        num_scalar_prefetch=1,                        # flattened token ids -> SMEM
        grid=(n_groups, steps),
        in_specs=[
            pl.BlockSpec(memory_space=pl.ANY),        # embedding table stays in HBM
            pl.BlockSpec((T, D), lambda g, s, toks: (0, 0)),     # pos_emb, resident
        ],
        out_specs=pl.BlockSpec((None, T, D),
                               lambda g, s, toks: (g * steps + s, 0, 0)),
        scratch_shapes=[
            pltpu.VMEM((2, T, D), tok_emb.dtype),     # double-buffered gather tile
            pltpu.SemaphoreType.DMA((2,)),            # one shared sem per slot
        ],
    )
    return pl.pallas_call(
        kernel,
        out_shape=jax.ShapeDtypeStruct((B, T, D), tok_emb.dtype),
        grid_spec=grid_spec,
        compiler_params=pltpu.CompilerParams(
            dimension_semantics=("parallel", "arbitrary")),
    )(tokens.reshape(-1).astype(jnp.int32), tok_emb, pos_emb)


# ===================== pure-JAX reference =====================

def clip_embedding_reference(tokens, tok_emb, pos_emb):
    return tok_emb[tokens] + pos_emb[None]


# ===================== main =====================

if __name__ == "__main__":
    # Scaled-down config (real module: n_vocab=49408, n_embd=768, n_token=77).
    n_vocab, n_embd, n_token = 1024, 128, 16
    B = 2

    key = jax.random.PRNGKey(0)
    k_tok, k_pos, k_ids = jax.random.split(key, 3)
    tok_emb = 0.02 * jax.random.normal(k_tok, (n_vocab, n_embd), dtype=jnp.float32)
    pos_emb = 0.02 * jax.random.normal(k_pos, (n_token, n_embd), dtype=jnp.float32)
    tokens = jax.random.randint(k_ids, (B, n_token), 0, n_vocab, dtype=jnp.int32)

    out = jax.block_until_ready(clip_embedding_pallas(tokens, tok_emb, pos_emb))
    ref = jax.block_until_ready(clip_embedding_reference(tokens, tok_emb, pos_emb))

    assert out.shape == (B, n_token, n_embd), out.shape
    np.testing.assert_allclose(np.asarray(out), np.asarray(ref),
                               atol=1e-6, rtol=1e-6)
    print("KERNEL_OK")
</pallas_src>

<mosaic_0001>
module attributes {stable_mosaic.version = 11 : i64} {
  func.func @_embedding_kernel(%arg0: i32, %arg1: i32, %arg2: memref<32xi32, #tpu.memory_space<smem>>, %arg3: memref<1024x128xf32, #tpu.memory_space<any>>, %arg4: memref<16x128xf32, #tpu.memory_space<vmem>>, %arg5: memref<1x16x128xf32, #tpu.memory_space<vmem>>, %arg6: memref<2x16x128xf32, #tpu.memory_space<vmem>>, %arg7: memref<2x!tpu.dma_semaphore, #tpu.memory_space<semaphore_mem>>) attributes {dimension_semantics = [#tpu.dimension_semantics<parallel>, #tpu.dimension_semantics<arbitrary>], iteration_bounds = array<i64: 1, 2>, scalar_prefetch = 1 : i64, scratch_operands = 2 : i64, tpu.core_type = #tpu.core_type<tc>, window_params = [{}, {pipeline_mode = #tpu.pipeline_mode<synchronous>, transform_indices = @transform_1, window_bounds = array<i64: 16, 128>}, {transform_indices = @transform_2, window_bounds = array<i64: 1, 16, 128>}]} {
    %c2_i32 = arith.constant 2 : i32
    %0 = arith.muli %arg0, %c2_i32 : i32
    %c0_i32 = arith.constant 0 : i32
    %1 = arith.cmpi eq, %arg1, %c0_i32 : i32
    %2 = arith.extui %1 : i1 to i32
    %c0_i32_0 = arith.constant 0 : i32
    %3 = arith.cmpi ne, %2, %c0_i32_0 : i32
    scf.if %3 {
      %c16_i32 = arith.constant 16 : i32
      %106 = arith.muli %0, %c16_i32 : i32
      %c0_i32_66 = arith.constant 0 : i32
      %107 = arith.addi %106, %c0_i32_66 : i32
      %108 = arith.index_cast %107 : i32 to index
      %109 = memref.load %arg2[%108] : memref<32xi32, #tpu.memory_space<smem>>
      %c0_i32_67 = arith.constant 0 : i32
      %110 = arith.maxsi %109, %c0_i32_67 : i32
      %c1023_i32 = arith.constant 1023 : i32
      %111 = arith.minsi %110, %c1023_i32 : i32
      %c0_i32_68 = arith.constant 0 : i32
      %c0_i32_69 = arith.constant 0 : i32
      %c0_i32_70 = arith.constant 0 : i32
      %112 = tpu.memref_slice %arg3[%111, %c0_i32_70] : memref<1024x128xf32, #tpu.memory_space<any>> -> memref<1x128xf32, #tpu.memory_space<any>>
      %c0_i32_71 = arith.constant 0 : i32
      %c0_i32_72 = arith.constant 0 : i32
      %113 = tpu.memref_slice %arg6[%c0_i32_68, %c0_i32_71, %c0_i32_72] : memref<2x16x128xf32, #tpu.memory_space<vmem>> -> memref<1x1x128xf32, #tpu.memory_space<vmem>>
      %114 = tpu.memref_squeeze %113 : memref<1x1x128xf32, #tpu.memory_space<vmem>> -> memref<1x128xf32, #tpu.memory_space<vmem>>
      %115 = tpu.memref_slice %arg7[%c0_i32_69] : memref<2x!tpu.dma_semaphore, #tpu.memory_space<semaphore_mem>> -> memref<1x!tpu.dma_semaphore, #tpu.memory_space<semaphore_mem>>
      %116 = tpu.memref_squeeze %115 : memref<1x!tpu.dma_semaphore, #tpu.memory_space<semaphore_mem>> -> memref<!tpu.dma_semaphore, #tpu.memory_space<semaphore_mem>>
      tpu.enqueue_dma source(%112 : memref<1x128xf32, #tpu.memory_space<any>>) target(%114 : memref<1x128xf32, #tpu.memory_space<vmem>>) target_semaphore(%116 : memref<!tpu.dma_semaphore, #tpu.memory_space<semaphore_mem>>)
      %c1_i32_73 = arith.constant 1 : i32
      %117 = arith.addi %106, %c1_i32_73 : i32
      %118 = arith.index_cast %117 : i32 to index
      %119 = memref.load %arg2[%118] : memref<32xi32, #tpu.memory_space<smem>>
      %c0_i32_74 = arith.constant 0 : i32
      %120 = arith.maxsi %119, %c0_i32_74 : i32
      %c1023_i32_75 = arith.constant 1023 : i32
      %121 = arith.minsi %120, %c1023_i32_75 : i32
      %c0_i32_76 = arith.constant 0 : i32
      %c0_i32_77 = arith.constant 0 : i32
      %c0_i32_78 = arith.constant 0 : i32
      %122 = tpu.memref_slice %arg3[%121, %c0_i32_78] : memref<1024x128xf32, #tpu.memory_space<any>> -> memref<1x128xf32, #tpu.memory_space<any>>
      %c1_i32_79 = arith.constant 1 : i32
      %c0_i32_80 = arith.constant 0 : i32
      %123 = tpu.memref_slice %arg6[%c0_i32_76, %c1_i32_79, %c0_i32_80] : memref<2x16x128xf32, #tpu.memory_space<vmem>> -> memref<1x1x128xf32, #tpu.memory_space<vmem>>
      %124 = tpu.memref_squeeze %123 : memref<1x1x128xf32, #tpu.memory_space<vmem>> -> memref<1x128xf32, #tpu.memory_space<vmem>>
      %125 = tpu.memref_slice %arg7[%c0_i32_77] : memref<2x!tpu.dma_semaphore, #tpu.memory_space<semaphore_mem>> -> memref<1x!tpu.dma_semaphore, #tpu.memory_space<semaphore_mem>>
      %126 = tpu.memref_squeeze %125 : memref<1x!tpu.dma_semaphore, #tpu.memory_space<semaphore_mem>> -> memref<!tpu.dma_semaphore, #tpu.memory_space<semaphore_mem>>
      tpu.enqueue_dma source(%122 : memref<1x128xf32, #tpu.memory_space<any>>) target(%124 : memref<1x128xf32, #tpu.memory_space<vmem>>) target_semaphore(%126 : memref<!tpu.dma_semaphore, #tpu.memory_space<semaphore_mem>>)
      %c2_i32_81 = arith.constant 2 : i32
      %127 = arith.addi %106, %c2_i32_81 : i32
      %128 = arith.index_cast %127 : i32 to index
      %129 = memref.load %arg2[%128] : memref<32xi32, #tpu.memory_space<smem>>
      %c0_i32_82 = arith.constant 0 : i32
      %130 = arith.maxsi %129, %c0_i32_82 : i32
      %c1023_i32_83 = arith.constant 1023 : i32
      %131 = arith.minsi %130, %c1023_i32_83 : i32
      %c0_i32_84 = arith.constant 0 : i32
      %c0_i32_85 = arith.constant 0 : i32
      %c0_i32_86 = arith.constant 0 : i32
      %132 = tpu.memref_slice %arg3[%131, %c0_i32_86] : memref<1024x128xf32, #tpu.memory_space<any>> -> memref<1x128xf32, #tpu.memory_space<any>>
      %c2_i32_87 = arith.constant 2 : i32
      %c0_i32_88 = arith.constant 0 : i32
      %133 = tpu.memref_slice %arg6[%c0_i32_84, %c2_i32_87, %c0_i32_88] : memref<2x16x128xf32, #tpu.memory_space<vmem>> -> memref<1x1x128xf32, #tpu.memory_space<vmem>>
      %134 = tpu.memref_squeeze %133 : memref<1x1x128xf32, #tpu.memory_space<vmem>> -> memref<1x128xf32, #tpu.memory_space<vmem>>
      %135 = tpu.memref_slice %arg7[%c0_i32_85] : memref<2x!tpu.dma_semaphore, #tpu.memory_space<semaphore_mem>> -> memref<1x!tpu.dma_semaphore, #tpu.memory_space<semaphore_mem>>
      %136 = tpu.memref_squeeze %135 : memref<1x!tpu.dma_semaphore, #tpu.memory_space<semaphore_mem>> -> memref<!tpu.dma_semaphore, #tpu.memory_space<semaphore_mem>>
      tpu.enqueue_dma source(%132 : memref<1x128xf32, #tpu.memory_space<any>>) target(%134 : memref<1x128xf32, #tpu.memory_space<vmem>>) target_semaphore(%136 : memref<!tpu.dma_semaphore, #tpu.memory_space<semaphore_mem>>)
      %c3_i32_89 = arith.constant 3 : i32
      %137 = arith.addi %106, %c3_i32_89 : i32
      %138 = arith.index_cast %137 : i32 to index
      %139 = memref.load %arg2[%138] : memref<32xi32, #tpu.memory_space<smem>>
      %c0_i32_90 = arith.constant 0 : i32
      %140 = arith.maxsi %139, %c0_i32_90 : i32
      %c1023_i32_91 = arith.constant 1023 : i32
      %141 = arith.minsi %140, %c1023_i32_91 : i32
      %c0_i32_92 = arith.constant 0 : i32
      %c0_i32_93 = arith.constant 0 : i32
      %c0_i32_94 = arith.constant 0 : i32
      %142 = tpu.memref_slice %arg3[%141, %c0_i32_94] : memref<1024x128xf32, #tpu.memory_space<any>> -> memref<1x128xf32, #tpu.memory_space<any>>
      %c3_i32_95 = arith.constant 3 : i32
      %c0_i32_96 = arith.constant 0 : i32
      %143 = tpu.memref_slice %arg6[%c0_i32_92, %c3_i32_95, %c0_i32_96] : memref<2x16x128xf32, #tpu.memory_space<vmem>> -> memref<1x1x128xf32, #tpu.memory_space<vmem>>
      %144 = tpu.memref_squeeze %143 : memref<1x1x128xf32, #tpu.memory_space<vmem>> -> memref<1x128xf32, #tpu.memory_space<vmem>>
      %145 = tpu.memref_slice %arg7[%c0_i32_93] : memref<2x!tpu.dma_semaphore, #tpu.memory_space<semaphore_mem>> -> memref<1x!tpu.dma_semaphore, #tpu.memory_space<semaphore_mem>>
      %146 = tpu.memref_squeeze %145 : memref<1x!tpu.dma_semaphore, #tpu.memory_space<semaphore_mem>> -> memref<!tpu.dma_semaphore, #tpu.memory_space<semaphore_mem>>
      tpu.enqueue_dma source(%142 : memref<1x128xf32, #tpu.memory_space<any>>) target(%144 : memref<1x128xf32, #tpu.memory_space<vmem>>) target_semaphore(%146 : memref<!tpu.dma_semaphore, #tpu.memory_space<semaphore_mem>>)
      %c4_i32_97 = arith.constant 4 : i32
      %147 = arith.addi %106, %c4_i32_97 : i32
      %148 = arith.index_cast %147 : i32 to index
      %149 = memref.load %arg2[%148] : memref<32xi32, #tpu.memory_space<smem>>
      %c0_i32_98 = arith.constant 0 : i32
      %150 = arith.maxsi %149, %c0_i32_98 : i32
      %c1023_i32_99 = arith.constant 1023 : i32
      %151 = arith.minsi %150, %c1023_i32_99 : i32
      %c0_i32_100 = arith.constant 0 : i32
      %c0_i32_101 = arith.constant 0 : i32
      %c0_i32_102 = arith.constant 0 : i32
      %152 = tpu.memref_slice %arg3[%151, %c0_i32_102] : memref<1024x128xf32, #tpu.memory_space<any>> -> memref<1x128xf32, #tpu.memory_space<any>>
      %c4_i32_103 = arith.constant 4 : i32
      %c0_i32_104 = arith.constant 0 : i32
      %153 = tpu.memref_slice %arg6[%c0_i32_100, %c4_i32_103, %c0_i32_104] : memref<2x16x128xf32, #tpu.memory_space<vmem>> -> memref<1x1x128xf32, #tpu.memory_space<vmem>>
      %154 = tpu.memref_squeeze %153 : memref<1x1x128xf32, #tpu.memory_space<vmem>> -> memref<1x128xf32, #tpu.memory_space<vmem>>
      %155 = tpu.memref_slice %arg7[%c0_i32_101] : memref<2x!tpu.dma_semaphore, #tpu.memory_space<semaphore_mem>> -> memref<1x!tpu.dma_semaphore, #tpu.memory_space<semaphore_mem>>
      %156 = tpu.memref_squeeze %155 : memref<1x!tpu.dma_semaphore, #tpu.memory_space<semaphore_mem>> -> memref<!tpu.dma_semaphore, #tpu.memory_space<semaphore_mem>>
      tpu.enqueue_dma source(%152 : memref<1x128xf32, #tpu.memory_space<any>>) target(%154 : memref<1x128xf32, #tpu.memory_space<vmem>>) target_semaphore(%156 : memref<!tpu.dma_semaphore, #tpu.memory_space<semaphore_mem>>)
      %c5_i32_105 = arith.constant 5 : i32
      %157 = arith.addi %106, %c5_i32_105 : i32
      %158 = arith.index_cast %157 : i32 to index
      %159 = memref.load %arg2[%158] : memref<32xi32, #tpu.memory_space<smem>>
      %c0_i32_106 = arith.constant 0 : i32
      %160 = arith.maxsi %159, %c0_i32_106 : i32
      %c1023_i32_107 = arith.constant 1023 : i32
      %161 = arith.minsi %160, %c1023_i32_107 : i32
      %c0_i32_108 = arith.constant 0 : i32
      %c0_i32_109 = arith.constant 0 : i32
      %c0_i32_110 = arith.constant 0 : i32
      %162 = tpu.memref_slice %arg3[%161, %c0_i32_110] : memref<1024x128xf32, #tpu.memory_space<any>> -> memref<1x128xf32, #tpu.memory_space<any>>
      %c5_i32_111 = arith.constant 5 : i32
      %c0_i32_112 = arith.constant 0 : i32
      %163 = tpu.memref_slice %arg6[%c0_i32_108, %c5_i32_111, %c0_i32_112] : memref<2x16x128xf32, #tpu.memory_space<vmem>> -> memref<1x1x128xf32, #tpu.memory_space<vmem>>
      %164 = tpu.memref_squeeze %163 : memref<1x1x128xf32, #tpu.memory_space<vmem>> -> memref<1x128xf32, #tpu.memory_space<vmem>>
      %165 = tpu.memref_slice %arg7[%c0_i32_109] : memref<2x!tpu.dma_semaphore, #tpu.memory_space<semaphore_mem>> -> memref<1x!tpu.dma_semaphore, #tpu.memory_space<semaphore_mem>>
      %166 = tpu.memref_squeeze %165 : memref<1x!tpu.dma_semaphore, #tpu.memory_space<semaphore_mem>> -> memref<!tpu.dma_semaphore, #tpu.memory_space<semaphore_mem>>
      tpu.enqueue_dma source(%162 : memref<1x128xf32, #tpu.memory_space<any>>) target(%164 : memref<1x128xf32, #tpu.memory_space<vmem>>) target_semaphore(%166 : memref<!tpu.dma_semaphore, #tpu.memory_space<semaphore_mem>>)
      %c6_i32_113 = arith.constant 6 : i32
      %167 = arith.addi %106, %c6_i32_113 : i32
      %168 = arith.index_cast %167 : i32 to index
      %169 = memref.load %arg2[%168] : memref<32xi32, #tpu.memory_space<smem>>
      %c0_i32_114 = arith.constant 0 : i32
      %170 = arith.maxsi %169, %c0_i32_114 : i32
      %c1023_i32_115 = arith.constant 1023 : i32
      %171 = arith.minsi %170, %c1023_i32_115 : i32
      %c0_i32_116 = arith.constant 0 : i32
      %c0_i32_117 = arith.constant 0 : i32
      %c0_i32_118 = arith.constant 0 : i32
      %172 = tpu.memref_slice %arg3[%171, %c0_i32_118] : memref<1024x128xf32, #tpu.memory_space<any>> -> memref<1x128xf32, #tpu.memory_space<any>>
      %c6_i32_119 = arith.constant 6 : i32
      %c0_i32_120 = arith.constant 0 : i32
      %173 = tpu.memref_slice %arg6[%c0_i32_116, %c6_i32_119, %c0_i32_120] : memref<2x16x128xf32, #tpu.memory_space<vmem>> -> memref<1x1x128xf32, #tpu.memory_space<vmem>>
      %174 = tpu.memref_squeeze %173 : memref<1x1x128xf32, #tpu.memory_space<vmem>> -> memref<1x128xf32, #tpu.memory_space<vmem>>
      %175 = tpu.memref_slice %arg7[%c0_i32_117] : memref<2x!tpu.dma_semaphore, #tpu.memory_space<semaphore_mem>> -> memref<1x!tpu.dma_semaphore, #tpu.memory_space<semaphore_mem>>
      %176 = tpu.memref_squeeze %175 : memref<1x!tpu.dma_semaphore, #tpu.memory_space<semaphore_mem>> -> memref<!tpu.dma_semaphore, #tpu.memory_space<semaphore_mem>>
      tpu.enqueue_dma source(%172 : memref<1x128xf32, #tpu.memory_space<any>>) target(%174 : memref<1x128xf32, #tpu.memory_space<vmem>>) target_semaphore(%176 : memref<!tpu.dma_semaphore, #tpu.memory_space<semaphore_mem>>)
      %c7_i32_121 = arith.constant 7 : i32
      %177 = arith.addi %106, %c7_i32_121 : i32
      %178 = arith.index_cast %177 : i32 to index
      %179 = memref.load %arg2[%178] : memref<32xi32, #tpu.memory_space<smem>>
      %c0_i32_122 = arith.constant 0 : i32
      %180 = arith.maxsi %179, %c0_i32_122 : i32
      %c1023_i32_123 = arith.constant 1023 : i32
      %181 = arith.minsi %180, %c1023_i32_123 : i32
      %c0_i32_124 = arith.constant 0 : i32
      %c0_i32_125 = arith.constant 0 : i32
      %c0_i32_126 = arith.constant 0 : i32
      %182 = tpu.memref_slice %arg3[%181, %c0_i32_126] : memref<1024x128xf32, #tpu.memory_space<any>> -> memref<1x128xf32, #tpu.memory_space<any>>
      %c7_i32_127 = arith.constant 7 : i32
      %c0_i32_128 = arith.constant 0 : i32
      %183 = tpu.memref_slice %arg6[%c0_i32_124, %c7_i32_127, %c0_i32_128] : memref<2x16x128xf32, #tpu.memory_space<vmem>> -> memref<1x1x128xf32, #tpu.memory_space<vmem>>
      %184 = tpu.memref_squeeze %183 : memref<1x1x128xf32, #tpu.memory_space<vmem>> -> memref<1x128xf32, #tpu.memory_space<vmem>>
      %185 = tpu.memref_slice %arg7[%c0_i32_125] : memref<2x!tpu.dma_semaphore, #tpu.memory_space<semaphore_mem>> -> memref<1x!tpu.dma_semaphore, #tpu.memory_space<semaphore_mem>>
      %186 = tpu.memref_squeeze %185 : memref<1x!tpu.dma_semaphore, #tpu.memory_space<semaphore_mem>> -> memref<!tpu.dma_semaphore, #tpu.memory_space<semaphore_mem>>
      tpu.enqueue_dma source(%182 : memref<1x128xf32, #tpu.memory_space<any>>) target(%184 : memref<1x128xf32, #tpu.memory_space<vmem>>) target_semaphore(%186 : memref<!tpu.dma_semaphore, #tpu.memory_space<semaphore_mem>>)
      %c8_i32_129 = arith.constant 8 : i32
      %187 = arith.addi %106, %c8_i32_129 : i32
      %188 = arith.index_cast %187 : i32 to index
      %189 = memref.load %arg2[%188] : memref<32xi32, #tpu.memory_space<smem>>
      %c0_i32_130 = arith.constant 0 : i32
      %190 = arith.maxsi %189, %c0_i32_130 : i32
      %c1023_i32_131 = arith.constant 1023 : i32
      %191 = arith.minsi %190, %c1023_i32_131 : i32
      %c0_i32_132 = arith.constant 0 : i32
      %c0_i32_133 = arith.constant 0 : i32
      %c0_i32_134 = arith.constant 0 : i32
      %192 = tpu.memref_slice %arg3[%191, %c0_i32_134] : memref<1024x128xf32, #tpu.memory_space<any>> -> memref<1x128xf32, #tpu.memory_space<any>>
      %c8_i32_135 = arith.constant 8 : i32
      %c0_i32_136 = arith.constant 0 : i32
      %193 = tpu.memref_slice %arg6[%c0_i32_132, %c8_i32_135, %c0_i32_136] : memref<2x16x128xf32, #tpu.memory_space<vmem>> -> memref<1x1x128xf32, #tpu.memory_space<vmem>>
      %194 = tpu.memref_squeeze %193 : memref<1x1x128xf32, #tpu.memory_space<vmem>> -> memref<1x128xf32, #tpu.memory_space<vmem>>
      %195 = tpu.memref_slice %arg7[%c0_i32_133] : memref<2x!tpu.dma_semaphore, #tpu.memory_space<semaphore_mem>> -> memref<1x!tpu.dma_semaphore, #tpu.memory_space<semaphore_mem>>
      %196 = tpu.memref_squeeze %195 : memref<1x!tpu.dma_semaphore, #tpu.memory_space<semaphore_mem>> -> memref<!tpu.dma_semaphore, #tpu.memory_space<semaphore_mem>>
      tpu.enqueue_dma source(%192 : memref<1x128xf32, #tpu.memory_space<any>>) target(%194 : memref<1x128xf32, #tpu.memory_space<vmem>>) target_semaphore(%196 : memref<!tpu.dma_semaphore, #tpu.memory_space<semaphore_mem>>)
      %c9_i32_137 = arith.constant 9 : i32
      %197 = arith.addi %106, %c9_i32_137 : i32
      %198 = arith.index_cast %197 : i32 to index
      %199 = memref.load %arg2[%198] : memref<32xi32, #tpu.memory_space<smem>>
      %c0_i32_138 = arith.constant 0 : i32
      %200 = arith.maxsi %199, %c0_i32_138 : i32
      %c1023_i32_139 = arith.constant 1023 : i32
      %201 = arith.minsi %200, %c1023_i32_139 : i32
      %c0_i32_140 = arith.constant 0 : i32
      %c0_i32_141 = arith.constant 0 : i32
      %c0_i32_142 = arith.constant 0 : i32
      %202 = tpu.memref_slice %arg3[%201, %c0_i32_142] : memref<1024x128xf32, #tpu.memory_space<any>> -> memref<1x128xf32, #tpu.memory_space<any>>
      %c9_i32_143 = arith.constant 9 : i32
      %c0_i32_144 = arith.constant 0 : i32
      %203 = tpu.memref_slice %arg6[%c0_i32_140, %c9_i32_143, %c0_i32_144] : memref<2x16x128xf32, #tpu.memory_space<vmem>> -> memref<1x1x128xf32, #tpu.memory_space<vmem>>
      %204 = tpu.memref_squeeze %203 : memref<1x1x128xf32, #tpu.memory_space<vmem>> -> memref<1x128xf32, #tpu.memory_space<vmem>>
      %205 = tpu.memref_slice %arg7[%c0_i32_141] : memref<2x!tpu.dma_semaphore, #tpu.memory_space<semaphore_mem>> -> memref<1x!tpu.dma_semaphore, #tpu.memory_space<semaphore_mem>>
      %206 = tpu.memref_squeeze %205 : memref<1x!tpu.dma_semaphore, #tpu.memory_space<semaphore_mem>> -> memref<!tpu.dma_semaphore, #tpu.memory_space<semaphore_mem>>
      tpu.enqueue_dma source(%202 : memref<1x128xf32, #tpu.memory_space<any>>) target(%204 : memref<1x128xf32, #tpu.memory_space<vmem>>) target_semaphore(%206 : memref<!tpu.dma_semaphore, #tpu.memory_space<semaphore_mem>>)
      %c10_i32_145 = arith.constant 10 : i32
      %207 = arith.addi %106, %c10_i32_145 : i32
      %208 = arith.index_cast %207 : i32 to index
      %209 = memref.load %arg2[%208] : memref<32xi32, #tpu.memory_space<smem>>
      %c0_i32_146 = arith.constant 0 : i32
      %210 = arith.maxsi %209, %c0_i32_146 : i32
      %c1023_i32_147 = arith.constant 1023 : i32
      %211 = arith.minsi %210, %c1023_i32_147 : i32
      %c0_i32_148 = arith.constant 0 : i32
      %c0_i32_149 = arith.constant 0 : i32
      %c0_i32_150 = arith.constant 0 : i32
      %212 = tpu.memref_slice %arg3[%211, %c0_i32_150] : memref<1024x128xf32, #tpu.memory_space<any>> -> memref<1x128xf32, #tpu.memory_space<any>>
      %c10_i32_151 = arith.constant 10 : i32
      %c0_i32_152 = arith.constant 0 : i32
      %213 = tpu.memref_slice %arg6[%c0_i32_148, %c10_i32_151, %c0_i32_152] : memref<2x16x128xf32, #tpu.memory_space<vmem>> -> memref<1x1x128xf32, #tpu.memory_space<vmem>>
      %214 = tpu.memref_squeeze %213 : memref<1x1x128xf32, #tpu.memory_space<vmem>> -> memref<1x128xf32, #tpu.memory_space<vmem>>
      %215 = tpu.memref_slice %arg7[%c0_i32_149] : memref<2x!tpu.dma_semaphore, #tpu.memory_space<semaphore_mem>> -> memref<1x!tpu.dma_semaphore, #tpu.memory_space<semaphore_mem>>
      %216 = tpu.memref_squeeze %215 : memref<1x!tpu.dma_semaphore, #tpu.memory_space<semaphore_mem>> -> memref<!tpu.dma_semaphore, #tpu.memory_space<semaphore_mem>>
      tpu.enqueue_dma source(%212 : memref<1x128xf32, #tpu.memory_space<any>>) target(%214 : memref<1x128xf32, #tpu.memory_space<vmem>>) target_semaphore(%216 : memref<!tpu.dma_semaphore, #tpu.memory_space<semaphore_mem>>)
      %c11_i32_153 = arith.constant 11 : i32
      %217 = arith.addi %106, %c11_i32_153 : i32
      %218 = arith.index_cast %217 : i32 to index
      %219 = memref.load %arg2[%218] : memref<32xi32, #tpu.memory_space<smem>>
      %c0_i32_154 = arith.constant 0 : i32
      %220 = arith.maxsi %219, %c0_i32_154 : i32
      %c1023_i32_155 = arith.constant 1023 : i32
      %221 = arith.minsi %220, %c1023_i32_155 : i32
      %c0_i32_156 = arith.constant 0 : i32
      %c0_i32_157 = arith.constant 0 : i32
      %c0_i32_158 = arith.constant 0 : i32
      %222 = tpu.memref_slice %arg3[%221, %c0_i32_158] : memref<1024x128xf32, #tpu.memory_space<any>> -> memref<1x128xf32, #tpu.memory_space<any>>
      %c11_i32_159 = arith.constant 11 : i32
      %c0_i32_160 = arith.constant 0 : i32
      %223 = tpu.memref_slice %arg6[%c0_i32_156, %c11_i32_159, %c0_i32_160] : memref<2x16x128xf32, #tpu.memory_space<vmem>> -> memref<1x1x128xf32, #tpu.memory_space<vmem>>
      %224 = tpu.memref_squeeze %223 : memref<1x1x128xf32, #tpu.memory_space<vmem>> -> memref<1x128xf32, #tpu.memory_space<vmem>>
      %225 = tpu.memref_slice %arg7[%c0_i32_157] : memref<2x!tpu.dma_semaphore, #tpu.memory_space<semaphore_mem>> -> memref<1x!tpu.dma_semaphore, #tpu.memory_space<semaphore_mem>>
      %226 = tpu.memref_squeeze %225 : memref<1x!tpu.dma_semaphore, #tpu.memory_space<semaphore_mem>> -> memref<!tpu.dma_semaphore, #tpu.memory_space<semaphore_mem>>
      tpu.enqueue_dma source(%222 : memref<1x128xf32, #tpu.memory_space<any>>) target(%224 : memref<1x128xf32, #tpu.memory_space<vmem>>) target_semaphore(%226 : memref<!tpu.dma_semaphore, #tpu.memory_space<semaphore_mem>>)
      %c12_i32_161 = arith.constant 12 : i32
      %227 = arith.addi %106, %c12_i32_161 : i32
      %228 = arith.index_cast %227 : i32 to index
      %229 = memref.load %arg2[%228] : memref<32xi32, #tpu.memory_space<smem>>
      %c0_i32_162 = arith.constant 0 : i32
      %230 = arith.maxsi %229, %c0_i32_162 : i32
      %c1023_i32_163 = arith.constant 1023 : i32
      %231 = arith.minsi %230, %c1023_i32_163 : i32
      %c0_i32_164 = arith.constant 0 : i32
      %c0_i32_165 = arith.constant 0 : i32
      %c0_i32_166 = arith.constant 0 : i32
      %232 = tpu.memref_slice %arg3[%231, %c0_i32_166] : memref<1024x128xf32, #tpu.memory_space<any>> -> memref<1x128xf32, #tpu.memory_space<any>>
      %c12_i32_167 = arith.constant 12 : i32
      %c0_i32_168 = arith.constant 0 : i32
      %233 = tpu.memref_slice %arg6[%c0_i32_164, %c12_i32_167, %c0_i32_168] : memref<2x16x128xf32, #tpu.memory_space<vmem>> -> memref<1x1x128xf32, #tpu.memory_space<vmem>>
      %234 = tpu.memref_squeeze %233 : memref<1x1x128xf32, #tpu.memory_space<vmem>> -> memref<1x128xf32, #tpu.memory_space<vmem>>
      %235 = tpu.memref_slice %arg7[%c0_i32_165] : memref<2x!tpu.dma_semaphore, #tpu.memory_space<semaphore_mem>> -> memref<1x!tpu.dma_semaphore, #tpu.memory_space<semaphore_mem>>
      %236 = tpu.memref_squeeze %235 : memref<1x!tpu.dma_semaphore, #tpu.memory_space<semaphore_mem>> -> memref<!tpu.dma_semaphore, #tpu.memory_space<semaphore_mem>>
      tpu.enqueue_dma source(%232 : memref<1x128xf32, #tpu.memory_space<any>>) target(%234 : memref<1x128xf32, #tpu.memory_space<vmem>>) target_semaphore(%236 : memref<!tpu.dma_semaphore, #tpu.memory_space<semaphore_mem>>)
      %c13_i32_169 = arith.constant 13 : i32
      %237 = arith.addi %106, %c13_i32_169 : i32
      %238 = arith.index_cast %237 : i32 to index
      %239 = memref.load %arg2[%238] : memref<32xi32, #tpu.memory_space<smem>>
      %c0_i32_170 = arith.constant 0 : i32
      %240 = arith.maxsi %239, %c0_i32_170 : i32
      %c1023_i32_171 = arith.constant 1023 : i32
      %241 = arith.minsi %240, %c1023_i32_171 : i32
      %c0_i32_172 = arith.constant 0 : i32
      %c0_i32_173 = arith.constant 0 : i32
      %c0_i32_174 = arith.constant 0 : i32
      %242 = tpu.memref_slice %arg3[%241, %c0_i32_174] : memref<1024x128xf32, #tpu.memory_space<any>> -> memref<1x128xf32, #tpu.memory_space<any>>
      %c13_i32_175 = arith.constant 13 : i32
      %c0_i32_176 = arith.constant 0 : i32
      %243 = tpu.memref_slice %arg6[%c0_i32_172, %c13_i32_175, %c0_i32_176] : memref<2x16x128xf32, #tpu.memory_space<vmem>> -> memref<1x1x128xf32, #tpu.memory_space<vmem>>
      %244 = tpu.memref_squeeze %243 : memref<1x1x128xf32, #tpu.memory_space<vmem>> -> memref<1x128xf32, #tpu.memory_space<vmem>>
      %245 = tpu.memref_slice %arg7[%c0_i32_173] : memref<2x!tpu.dma_semaphore, #tpu.memory_space<semaphore_mem>> -> memref<1x!tpu.dma_semaphore, #tpu.memory_space<semaphore_mem>>
      %246 = tpu.memref_squeeze %245 : memref<1x!tpu.dma_semaphore, #tpu.memory_space<semaphore_mem>> -> memref<!tpu.dma_semaphore, #tpu.memory_space<semaphore_mem>>
      tpu.enqueue_dma source(%242 : memref<1x128xf32, #tpu.memory_space<any>>) target(%244 : memref<1x128xf32, #tpu.memory_space<vmem>>) target_semaphore(%246 : memref<!tpu.dma_semaphore, #tpu.memory_space<semaphore_mem>>)
      %c14_i32_177 = arith.constant 14 : i32
      %247 = arith.addi %106, %c14_i32_177 : i32
      %248 = arith.index_cast %247 : i32 to index
      %249 = memref.load %arg2[%248] : memref<32xi32, #tpu.memory_space<smem>>
      %c0_i32_178 = arith.constant 0 : i32
      %250 = arith.maxsi %249, %c0_i32_178 : i32
      %c1023_i32_179 = arith.constant 1023 : i32
      %251 = arith.minsi %250, %c1023_i32_179 : i32
      %c0_i32_180 = arith.constant 0 : i32
      %c0_i32_181 = arith.constant 0 : i32
      %c0_i32_182 = arith.constant 0 : i32
      %252 = tpu.memref_slice %arg3[%251, %c0_i32_182] : memref<1024x128xf32, #tpu.memory_space<any>> -> memref<1x128xf32, #tpu.memory_space<any>>
      %c14_i32_183 = arith.constant 14 : i32
      %c0_i32_184 = arith.constant 0 : i32
      %253 = tpu.memref_slice %arg6[%c0_i32_180, %c14_i32_183, %c0_i32_184] : memref<2x16x128xf32, #tpu.memory_space<vmem>> -> memref<1x1x128xf32, #tpu.memory_space<vmem>>
      %254 = tpu.memref_squeeze %253 : memref<1x1x128xf32, #tpu.memory_space<vmem>> -> memref<1x128xf32, #tpu.memory_space<vmem>>
      %255 = tpu.memref_slice %arg7[%c0_i32_181] : memref<2x!tpu.dma_semaphore, #tpu.memory_space<semaphore_mem>> -> memref<1x!tpu.dma_semaphore, #tpu.memory_space<semaphore_mem>>
      %256 = tpu.memref_squeeze %255 : memref<1x!tpu.dma_semaphore, #tpu.memory_space<semaphore_mem>> -> memref<!tpu.dma_semaphore, #tpu.memory_space<semaphore_mem>>
      tpu.enqueue_dma source(%252 : memref<1x128xf32, #tpu.memory_space<any>>) target(%254 : memref<1x128xf32, #tpu.memory_space<vmem>>) target_semaphore(%256 : memref<!tpu.dma_semaphore, #tpu.memory_space<semaphore_mem>>)
      %c15_i32_185 = arith.constant 15 : i32
      %257 = arith.addi %106, %c15_i32_185 : i32
      %258 = arith.index_cast %257 : i32 to index
      %259 = memref.load %arg2[%258] : memref<32xi32, #tpu.memory_space<smem>>
      %c0_i32_186 = arith.constant 0 : i32
      %260 = arith.maxsi %259, %c0_i32_186 : i32
      %c1023_i32_187 = arith.constant 1023 : i32
      %261 = arith.minsi %260, %c1023_i32_187 : i32
      %c0_i32_188 = arith.constant 0 : i32
      %c0_i32_189 = arith.constant 0 : i32
      %c0_i32_190 = arith.constant 0 : i32
      %262 = tpu.memref_slice %arg3[%261, %c0_i32_190] : memref<1024x128xf32, #tpu.memory_space<any>> -> memref<1x128xf32, #tpu.memory_space<any>>
      %c15_i32_191 = arith.constant 15 : i32
      %c0_i32_192 = arith.constant 0 : i32
      %263 = tpu.memref_slice %arg6[%c0_i32_188, %c15_i32_191, %c0_i32_192] : memref<2x16x128xf32, #tpu.memory_space<vmem>> -> memref<1x1x128xf32, #tpu.memory_space<vmem>>
      %264 = tpu.memref_squeeze %263 : memref<1x1x128xf32, #tpu.memory_space<vmem>> -> memref<1x128xf32, #tpu.memory_space<vmem>>
      %265 = tpu.memref_slice %arg7[%c0_i32_189] : memref<2x!tpu.dma_semaphore, #tpu.memory_space<semaphore_mem>> -> memref<1x!tpu.dma_semaphore, #tpu.memory_space<semaphore_mem>>
      %266 = tpu.memref_squeeze %265 : memref<1x!tpu.dma_semaphore, #tpu.memory_space<semaphore_mem>> -> memref<!tpu.dma_semaphore, #tpu.memory_space<semaphore_mem>>
      tpu.enqueue_dma source(%262 : memref<1x128xf32, #tpu.memory_space<any>>) target(%264 : memref<1x128xf32, #tpu.memory_space<vmem>>) target_semaphore(%266 : memref<!tpu.dma_semaphore, #tpu.memory_space<semaphore_mem>>)
    } else {
    }
    %c1_i32 = arith.constant 1 : i32
    %4 = arith.addi %arg1, %c1_i32 : i32
    %c2_i32_1 = arith.constant 2 : i32
    %5 = arith.cmpi slt, %4, %c2_i32_1 : i32
    %6 = arith.extui %5 : i1 to i32
    %c0_i32_2 = arith.constant 0 : i32
    %7 = arith.cmpi ne, %6, %c0_i32_2 : i32
    scf.if %7 {
      %106 = arith.addi %0, %arg1 : i32
      %c1_i32_66 = arith.constant 1 : i32
      %107 = arith.addi %106, %c1_i32_66 : i32
      %c1_i32_67 = arith.constant 1 : i32
      %108 = arith.addi %arg1, %c1_i32_67 : i32
      %c2_i32_68 = arith.constant 2 : i32
      %c0_i32_69 = arith.constant 0 : i32
      %109 = arith.cmpi eq, %c2_i32_68, %c0_i32_69 : i32
      %c1_i32_70 = arith.constant 1 : i32
      %110 = arith.select %109, %c1_i32_70, %c2_i32_68 : i32
      %111 = arith.remsi %108, %110 : i32
      %c0_i32_71 = arith.constant 0 : i32
      %112 = arith.cmpi ne, %111, %c0_i32_71 : i32
      %c0_i32_72 = arith.constant 0 : i32
      %113 = arith.cmpi slt, %111, %c0_i32_72 : i32
      %c0_i32_73 = arith.constant 0 : i32
      %114 = arith.cmpi slt, %110, %c0_i32_73 : i32
      %115 = arith.xori %113, %114 : i1
      %116 = arith.andi %115, %112 : i1
      %117 = arith.addi %111, %110 : i32
      %118 = arith.select %116, %117, %111 : i32
      %c16_i32 = arith.constant 16 : i32
      %119 = arith.muli %107, %c16_i32 : i32
      %c0_i32_74 = arith.constant 0 : i32
      %120 = arith.addi %119, %c0_i32_74 : i32
      %121 = arith.index_cast %120 : i32 to index
      %122 = memref.load %arg2[%121] : memref<32xi32, #tpu.memory_space<smem>>
      %c0_i32_75 = arith.constant 0 : i32
      %123 = arith.maxsi %122, %c0_i32_75 : i32
      %c1023_i32 = arith.constant 1023 : i32
      %124 = arith.minsi %123, %c1023_i32 : i32
      %c0_i32_76 = arith.constant 0 : i32
      %125 = tpu.memref_slice %arg3[%124, %c0_i32_76] : memref<1024x128xf32, #tpu.memory_space<any>> -> memref<1x128xf32, #tpu.memory_space<any>>
      %c0_i32_77 = arith.constant 0 : i32
      %c0_i32_78 = arith.constant 0 : i32
      %126 = tpu.memref_slice %arg6[%118, %c0_i32_77, %c0_i32_78] : memref<2x16x128xf32, #tpu.memory_space<vmem>> -> memref<1x1x128xf32, #tpu.memory_space<vmem>>
      %127 = tpu.memref_squeeze %126 : memref<1x1x128xf32, #tpu.memory_space<vmem>> -> memref<1x128xf32, #tpu.memory_space<vmem>>
      %128 = tpu.memref_slice %arg7[%118] : memref<2x!tpu.dma_semaphore, #tpu.memory_space<semaphore_mem>> -> memref<1x!tpu.dma_semaphore, #tpu.memory_space<semaphore_mem>>
      %129 = tpu.memref_squeeze %128 : memref<1x!tpu.dma_semaphore, #tpu.memory_space<semaphore_mem>> -> memref<!tpu.dma_semaphore, #tpu.memory_space<semaphore_mem>>
      tpu.enqueue_dma source(%125 : memref<1x128xf32, #tpu.memory_space<any>>) target(%127 : memref<1x128xf32, #tpu.memory_space<vmem>>) target_semaphore(%129 : memref<!tpu.dma_semaphore, #tpu.memory_space<semaphore_mem>>)
      %c1_i32_79 = arith.constant 1 : i32
      %130 = arith.addi %119, %c1_i32_79 : i32
      %131 = arith.index_cast %130 : i32 to index
      %132 = memref.load %arg2[%131] : memref<32xi32, #tpu.memory_space<smem>>
      %c0_i32_80 = arith.constant 0 : i32
      %133 = arith.maxsi %132, %c0_i32_80 : i32
      %c1023_i32_81 = arith.constant 1023 : i32
      %134 = arith.minsi %133, %c1023_i32_81 : i32
      %c0_i32_82 = arith.constant 0 : i32
      %135 = tpu.memref_slice %arg3[%134, %c0_i32_82] : memref<1024x128xf32, #tpu.memory_space<any>> -> memref<1x128xf32, #tpu.memory_space<any>>
      %c1_i32_83 = arith.constant 1 : i32
      %c0_i32_84 = arith.constant 0 : i32
      %136 = tpu.memref_slice %arg6[%118, %c1_i32_83, %c0_i32_84] : memref<2x16x128xf32, #tpu.memory_space<vmem>> -> memref<1x1x128xf32, #tpu.memory_space<vmem>>
      %137 = tpu.memref_squeeze %136 : memref<1x1x128xf32, #tpu.memory_space<vmem>> -> memref<1x128xf32, #tpu.memory_space<vmem>>
      %138 = tpu.memref_slice %arg7[%118] : memref<2x!tpu.dma_semaphore, #tpu.memory_space<semaphore_mem>> -> memref<1x!tpu.dma_semaphore, #tpu.memory_space<semaphore_mem>>
      %139 = tpu.memref_squeeze %138 : memref<1x!tpu.dma_semaphore, #tpu.memory_space<semaphore_mem>> -> memref<!tpu.dma_semaphore, #tpu.memory_space<semaphore_mem>>
      tpu.enqueue_dma source(%135 : memref<1x128xf32, #tpu.memory_space<any>>) target(%137 : memref<1x128xf32, #tpu.memory_space<vmem>>) target_semaphore(%139 : memref<!tpu.dma_semaphore, #tpu.memory_space<semaphore_mem>>)
      %c2_i32_85 = arith.constant 2 : i32
      %140 = arith.addi %119, %c2_i32_85 : i32
      %141 = arith.index_cast %140 : i32 to index
      %142 = memref.load %arg2[%141] : memref<32xi32, #tpu.memory_space<smem>>
      %c0_i32_86 = arith.constant 0 : i32
      %143 = arith.maxsi %142, %c0_i32_86 : i32
      %c1023_i32_87 = arith.constant 1023 : i32
      %144 = arith.minsi %143, %c1023_i32_87 : i32
      %c0_i32_88 = arith.constant 0 : i32
      %145 = tpu.memref_slice %arg3[%144, %c0_i32_88] : memref<1024x128xf32, #tpu.memory_space<any>> -> memref<1x128xf32, #tpu.memory_space<any>>
      %c2_i32_89 = arith.constant 2 : i32
      %c0_i32_90 = arith.constant 0 : i32
      %146 = tpu.memref_slice %arg6[%118, %c2_i32_89, %c0_i32_90] : memref<2x16x128xf32, #tpu.memory_space<vmem>> -> memref<1x1x128xf32, #tpu.memory_space<vmem>>
      %147 = tpu.memref_squeeze %146 : memref<1x1x128xf32, #tpu.memory_space<vmem>> -> memref<1x128xf32, #tpu.memory_space<vmem>>
      %148 = tpu.memref_slice %arg7[%118] : memref<2x!tpu.dma_semaphore, #tpu.memory_space<semaphore_mem>> -> memref<1x!tpu.dma_semaphore, #tpu.memory_space<semaphore_mem>>
      %149 = tpu.memref_squeeze %148 : memref<1x!tpu.dma_semaphore, #tpu.memory_space<semaphore_mem>> -> memref<!tpu.dma_semaphore, #tpu.memory_space<semaphore_mem>>
      tpu.enqueue_dma source(%145 : memref<1x128xf32, #tpu.memory_space<any>>) target(%147 : memref<1x128xf32, #tpu.memory_space<vmem>>) target_semaphore(%149 : memref<!tpu.dma_semaphore, #tpu.memory_space<semaphore_mem>>)
      %c3_i32_91 = arith.constant 3 : i32
      %150 = arith.addi %119, %c3_i32_91 : i32
      %151 = arith.index_cast %150 : i32 to index
      %152 = memref.load %arg2[%151] : memref<32xi32, #tpu.memory_space<smem>>
      %c0_i32_92 = arith.constant 0 : i32
      %153 = arith.maxsi %152, %c0_i32_92 : i32
      %c1023_i32_93 = arith.constant 1023 : i32
      %154 = arith.minsi %153, %c1023_i32_93 : i32
      %c0_i32_94 = arith.constant 0 : i32
      %155 = tpu.memref_slice %arg3[%154, %c0_i32_94] : memref<1024x128xf32, #tpu.memory_space<any>> -> memref<1x128xf32, #tpu.memory_space<any>>
      %c3_i32_95 = arith.constant 3 : i32
      %c0_i32_96 = arith.constant 0 : i32
      %156 = tpu.memref_slice %arg6[%118, %c3_i32_95, %c0_i32_96] : memref<2x16x128xf32, #tpu.memory_space<vmem>> -> memref<1x1x128xf32, #tpu.memory_space<vmem>>
      %157 = tpu.memref_squeeze %156 : memref<1x1x128xf32, #tpu.memory_space<vmem>> -> memref<1x128xf32, #tpu.memory_space<vmem>>
      %158 = tpu.memref_slice %arg7[%118] : memref<2x!tpu.dma_semaphore, #tpu.memory_space<semaphore_mem>> -> memref<1x!tpu.dma_semaphore, #tpu.memory_space<semaphore_mem>>
      %159 = tpu.memref_squeeze %158 : memref<1x!tpu.dma_semaphore, #tpu.memory_space<semaphore_mem>> -> memref<!tpu.dma_semaphore, #tpu.memory_space<semaphore_mem>>
      tpu.enqueue_dma source(%155 : memref<1x128xf32, #tpu.memory_space<any>>) target(%157 : memref<1x128xf32, #tpu.memory_space<vmem>>) target_semaphore(%159 : memref<!tpu.dma_semaphore, #tpu.memory_space<semaphore_mem>>)
      %c4_i32_97 = arith.constant 4 : i32
      %160 = arith.addi %119, %c4_i32_97 : i32
      %161 = arith.index_cast %160 : i32 to index
      %162 = memref.load %arg2[%161] : memref<32xi32, #tpu.memory_space<smem>>
      %c0_i32_98 = arith.constant 0 : i32
      %163 = arith.maxsi %162, %c0_i32_98 : i32
      %c1023_i32_99 = arith.constant 1023 : i32
      %164 = arith.minsi %163, %c1023_i32_99 : i32
      %c0_i32_100 = arith.constant 0 : i32
      %165 = tpu.memref_slice %arg3[%164, %c0_i32_100] : memref<1024x128xf32, #tpu.memory_space<any>> -> memref<1x128xf32, #tpu.memory_space<any>>
      %c4_i32_101 = arith.constant 4 : i32
      %c0_i32_102 = arith.constant 0 : i32
      %166 = tpu.memref_slice %arg6[%118, %c4_i32_101, %c0_i32_102] : memref<2x16x128xf32, #tpu.memory_space<vmem>> -> memref<1x1x128xf32, #tpu.memory_space<vmem>>
      %167 = tpu.memref_squeeze %166 : memref<1x1x128xf32, #tpu.memory_space<vmem>> -> memref<1x128xf32, #tpu.memory_space<vmem>>
      %168 = tpu.memref_slice %arg7[%118] : memref<2x!tpu.dma_semaphore, #tpu.memory_space<semaphore_mem>> -> memref<1x!tpu.dma_semaphore, #tpu.memory_space<semaphore_mem>>
      %169 = tpu.memref_squeeze %168 : memref<1x!tpu.dma_semaphore, #tpu.memory_space<semaphore_mem>> -> memref<!tpu.dma_semaphore, #tpu.memory_space<semaphore_mem>>
      tpu.enqueue_dma source(%165 : memref<1x128xf32, #tpu.memory_space<any>>) target(%167 : memref<1x128xf32, #tpu.memory_space<vmem>>) target_semaphore(%169 : memref<!tpu.dma_semaphore, #tpu.memory_space<semaphore_mem>>)
      %c5_i32_103 = arith.constant 5 : i32
      %170 = arith.addi %119, %c5_i32_103 : i32
      %171 = arith.index_cast %170 : i32 to index
      %172 = memref.load %arg2[%171] : memref<32xi32, #tpu.memory_space<smem>>
      %c0_i32_104 = arith.constant 0 : i32
      %173 = arith.maxsi %172, %c0_i32_104 : i32
      %c1023_i32_105 = arith.constant 1023 : i32
      %174 = arith.minsi %173, %c1023_i32_105 : i32
      %c0_i32_106 = arith.constant 0 : i32
      %175 = tpu.memref_slice %arg3[%174, %c0_i32_106] : memref<1024x128xf32, #tpu.memory_space<any>> -> memref<1x128xf32, #tpu.memory_space<any>>
      %c5_i32_107 = arith.constant 5 : i32
      %c0_i32_108 = arith.constant 0 : i32
      %176 = tpu.memref_slice %arg6[%118, %c5_i32_107, %c0_i32_108] : memref<2x16x128xf32, #tpu.memory_space<vmem>> -> memref<1x1x128xf32, #tpu.memory_space<vmem>>
      %177 = tpu.memref_squeeze %176 : memref<1x1x128xf32, #tpu.memory_space<vmem>> -> memref<1x128xf32, #tpu.memory_space<vmem>>
      %178 = tpu.memref_slice %arg7[%118] : memref<2x!tpu.dma_semaphore, #tpu.memory_space<semaphore_mem>> -> memref<1x!tpu.dma_semaphore, #tpu.memory_space<semaphore_mem>>
      %179 = tpu.memref_squeeze %178 : memref<1x!tpu.dma_semaphore, #tpu.memory_space<semaphore_mem>> -> memref<!tpu.dma_semaphore, #tpu.memory_space<semaphore_mem>>
      tpu.enqueue_dma source(%175 : memref<1x128xf32, #tpu.memory_space<any>>) target(%177 : memref<1x128xf32, #tpu.memory_space<vmem>>) target_semaphore(%179 : memref<!tpu.dma_semaphore, #tpu.memory_space<semaphore_mem>>)
      %c6_i32_109 = arith.constant 6 : i32
      %180 = arith.addi %119, %c6_i32_109 : i32
      %181 = arith.index_cast %180 : i32 to index
      %182 = memref.load %arg2[%181] : memref<32xi32, #tpu.memory_space<smem>>
      %c0_i32_110 = arith.constant 0 : i32
      %183 = arith.maxsi %182, %c0_i32_110 : i32
      %c1023_i32_111 = arith.constant 1023 : i32
      %184 = arith.minsi %183, %c1023_i32_111 : i32
      %c0_i32_112 = arith.constant 0 : i32
      %185 = tpu.memref_slice %arg3[%184, %c0_i32_112] : memref<1024x128xf32, #tpu.memory_space<any>> -> memref<1x128xf32, #tpu.memory_space<any>>
      %c6_i32_113 = arith.constant 6 : i32
      %c0_i32_114 = arith.constant 0 : i32
      %186 = tpu.memref_slice %arg6[%118, %c6_i32_113, %c0_i32_114] : memref<2x16x128xf32, #tpu.memory_space<vmem>> -> memref<1x1x128xf32, #tpu.memory_space<vmem>>
      %187 = tpu.memref_squeeze %186 : memref<1x1x128xf32, #tpu.memory_space<vmem>> -> memref<1x128xf32, #tpu.memory_space<vmem>>
      %188 = tpu.memref_slice %arg7[%118] : memref<2x!tpu.dma_semaphore, #tpu.memory_space<semaphore_mem>> -> memref<1x!tpu.dma_semaphore, #tpu.memory_space<semaphore_mem>>
      %189 = tpu.memref_squeeze %188 : memref<1x!tpu.dma_semaphore, #tpu.memory_space<semaphore_mem>> -> memref<!tpu.dma_semaphore, #tpu.memory_space<semaphore_mem>>
      tpu.enqueue_dma source(%185 : memref<1x128xf32, #tpu.memory_space<any>>) target(%187 : memref<1x128xf32, #tpu.memory_space<vmem>>) target_semaphore(%189 : memref<!tpu.dma_semaphore, #tpu.memory_space<semaphore_mem>>)
      %c7_i32_115 = arith.constant 7 : i32
      %190 = arith.addi %119, %c7_i32_115 : i32
      %191 = arith.index_cast %190 : i32 to index
      %192 = memref.load %arg2[%191] : memref<32xi32, #tpu.memory_space<smem>>
      %c0_i32_116 = arith.constant 0 : i32
      %193 = arith.maxsi %192, %c0_i32_116 : i32
      %c1023_i32_117 = arith.constant 1023 : i32
      %194 = arith.minsi %193, %c1023_i32_117 : i32
      %c0_i32_118 = arith.constant 0 : i32
      %195 = tpu.memref_slice %arg3[%194, %c0_i32_118] : memref<1024x128xf32, #tpu.memory_space<any>> -> memref<1x128xf32, #tpu.memory_space<any>>
      %c7_i32_119 = arith.constant 7 : i32
      %c0_i32_120 = arith.constant 0 : i32
      %196 = tpu.memref_slice %arg6[%118, %c7_i32_119, %c0_i32_120] : memref<2x16x128xf32, #tpu.memory_space<vmem>> -> memref<1x1x128xf32, #tpu.memory_space<vmem>>
      %197 = tpu.memref_squeeze %196 : memref<1x1x128xf32, #tpu.memory_space<vmem>> -> memref<1x128xf32, #tpu.memory_space<vmem>>
      %198 = tpu.memref_slice %arg7[%118] : memref<2x!tpu.dma_semaphore, #tpu.memory_space<semaphore_mem>> -> memref<1x!tpu.dma_semaphore, #tpu.memory_space<semaphore_mem>>
      %199 = tpu.memref_squeeze %198 : memref<1x!tpu.dma_semaphore, #tpu.memory_space<semaphore_mem>> -> memref<!tpu.dma_semaphore, #tpu.memory_space<semaphore_mem>>
      tpu.enqueue_dma source(%195 : memref<1x128xf32, #tpu.memory_space<any>>) target(%197 : memref<1x128xf32, #tpu.memory_space<vmem>>) target_semaphore(%199 : memref<!tpu.dma_semaphore, #tpu.memory_space<semaphore_mem>>)
      %c8_i32_121 = arith.constant 8 : i32
      %200 = arith.addi %119, %c8_i32_121 : i32
      %201 = arith.index_cast %200 : i32 to index
      %202 = memref.load %arg2[%201] : memref<32xi32, #tpu.memory_space<smem>>
      %c0_i32_122 = arith.constant 0 : i32
      %203 = arith.maxsi %202, %c0_i32_122 : i32
      %c1023_i32_123 = arith.constant 1023 : i32
      %204 = arith.minsi %203, %c1023_i32_123 : i32
      %c0_i32_124 = arith.constant 0 : i32
      %205 = tpu.memref_slice %arg3[%204, %c0_i32_124] : memref<1024x128xf32, #tpu.memory_space<any>> -> memref<1x128xf32, #tpu.memory_space<any>>
      %c8_i32_125 = arith.constant 8 : i32
      %c0_i32_126 = arith.constant 0 : i32
      %206 = tpu.memref_slice %arg6[%118, %c8_i32_125, %c0_i32_126] : memref<2x16x128xf32, #tpu.memory_space<vmem>> -> memref<1x1x128xf32, #tpu.memory_space<vmem>>
      %207 = tpu.memref_squeeze %206 : memref<1x1x128xf32, #tpu.memory_space<vmem>> -> memref<1x128xf32, #tpu.memory_space<vmem>>
      %208 = tpu.memref_slice %arg7[%118] : memref<2x!tpu.dma_semaphore, #tpu.memory_space<semaphore_mem>> -> memref<1x!tpu.dma_semaphore, #tpu.memory_space<semaphore_mem>>
      %209 = tpu.memref_squeeze %208 : memref<1x!tpu.dma_semaphore, #tpu.memory_space<semaphore_mem>> -> memref<!tpu.dma_semaphore, #tpu.memory_space<semaphore_mem>>
      tpu.enqueue_dma source(%205 : memref<1x128xf32, #tpu.memory_space<any>>) target(%207 : memref<1x128xf32, #tpu.memory_space<vmem>>) target_semaphore(%209 : memref<!tpu.dma_semaphore, #tpu.memory_space<semaphore_mem>>)
      %c9_i32_127 = arith.constant 9 : i32
      %210 = arith.addi %119, %c9_i32_127 : i32
      %211 = arith.index_cast %210 : i32 to index
      %212 = memref.load %arg2[%211] : memref<32xi32, #tpu.memory_space<smem>>
      %c0_i32_128 = arith.constant 0 : i32
      %213 = arith.maxsi %212, %c0_i32_128 : i32
      %c1023_i32_129 = arith.constant 1023 : i32
      %214 = arith.minsi %213, %c1023_i32_129 : i32
      %c0_i32_130 = arith.constant 0 : i32
      %215 = tpu.memref_slice %arg3[%214, %c0_i32_130] : memref<1024x128xf32, #tpu.memory_space<any>> -> memref<1x128xf32, #tpu.memory_space<any>>
      %c9_i32_131 = arith.constant 9 : i32
      %c0_i32_132 = arith.constant 0 : i32
      %216 = tpu.memref_slice %arg6[%118, %c9_i32_131, %c0_i32_132] : memref<2x16x128xf32, #tpu.memory_space<vmem>> -> memref<1x1x128xf32, #tpu.memory_space<vmem>>
      %217 = tpu.memref_squeeze %216 : memref<1x1x128xf32, #tpu.memory_space<vmem>> -> memref<1x128xf32, #tpu.memory_space<vmem>>
      %218 = tpu.memref_slice %arg7[%118] : memref<2x!tpu.dma_semaphore, #tpu.memory_space<semaphore_mem>> -> memref<1x!tpu.dma_semaphore, #tpu.memory_space<semaphore_mem>>
      %219 = tpu.memref_squeeze %218 : memref<1x!tpu.dma_semaphore, #tpu.memory_space<semaphore_mem>> -> memref<!tpu.dma_semaphore, #tpu.memory_space<semaphore_mem>>
      tpu.enqueue_dma source(%215 : memref<1x128xf32, #tpu.memory_space<any>>) target(%217 : memref<1x128xf32, #tpu.memory_space<vmem>>) target_semaphore(%219 : memref<!tpu.dma_semaphore, #tpu.memory_space<semaphore_mem>>)
      %c10_i32_133 = arith.constant 10 : i32
      %220 = arith.addi %119, %c10_i32_133 : i32
      %221 = arith.index_cast %220 : i32 to index
      %222 = memref.load %arg2[%221] : memref<32xi32, #tpu.memory_space<smem>>
      %c0_i32_134 = arith.constant 0 : i32
      %223 = arith.maxsi %222, %c0_i32_134 : i32
      %c1023_i32_135 = arith.constant 1023 : i32
      %224 = arith.minsi %223, %c1023_i32_135 : i32
      %c0_i32_136 = arith.constant 0 : i32
      %225 = tpu.memref_slice %arg3[%224, %c0_i32_136] : memref<1024x128xf32, #tpu.memory_space<any>> -> memref<1x128xf32, #tpu.memory_space<any>>
      %c10_i32_137 = arith.constant 10 : i32
      %c0_i32_138 = arith.constant 0 : i32
      %226 = tpu.memref_slice %arg6[%118, %c10_i32_137, %c0_i32_138] : memref<2x16x128xf32, #tpu.memory_space<vmem>> -> memref<1x1x128xf32, #tpu.memory_space<vmem>>
      %227 = tpu.memref_squeeze %226 : memref<1x1x128xf32, #tpu.memory_space<vmem>> -> memref<1x128xf32, #tpu.memory_space<vmem>>
      %228 = tpu.memref_slice %arg7[%118] : memref<2x!tpu.dma_semaphore, #tpu.memory_space<semaphore_mem>> -> memref<1x!tpu.dma_semaphore, #tpu.memory_space<semaphore_mem>>
      %229 = tpu.memref_squeeze %228 : memref<1x!tpu.dma_semaphore, #tpu.memory_space<semaphore_mem>> -> memref<!tpu.dma_semaphore, #tpu.memory_space<semaphore_mem>>
      tpu.enqueue_dma source(%225 : memref<1x128xf32, #tpu.memory_space<any>>) target(%227 : memref<1x128xf32, #tpu.memory_space<vmem>>) target_semaphore(%229 : memref<!tpu.dma_semaphore, #tpu.memory_space<semaphore_mem>>)
      %c11_i32_139 = arith.constant 11 : i32
      %230 = arith.addi %119, %c11_i32_139 : i32
      %231 = arith.index_cast %230 : i32 to index
      %232 = memref.load %arg2[%231] : memref<32xi32, #tpu.memory_space<smem>>
      %c0_i32_140 = arith.constant 0 : i32
      %233 = arith.maxsi %232, %c0_i32_140 : i32
      %c1023_i32_141 = arith.constant 1023 : i32
      %234 = arith.minsi %233, %c1023_i32_141 : i32
      %c0_i32_142 = arith.constant 0 : i32
      %235 = tpu.memref_slice %arg3[%234, %c0_i32_142] : memref<1024x128xf32, #tpu.memory_space<any>> -> memref<1x128xf32, #tpu.memory_space<any>>
      %c11_i32_143 = arith.constant 11 : i32
      %c0_i32_144 = arith.constant 0 : i32
      %236 = tpu.memref_slice %arg6[%118, %c11_i32_143, %c0_i32_144] : memref<2x16x128xf32, #tpu.memory_space<vmem>> -> memref<1x1x128xf32, #tpu.memory_space<vmem>>
      %237 = tpu.memref_squeeze %236 : memref<1x1x128xf32, #tpu.memory_space<vmem>> -> memref<1x128xf32, #tpu.memory_space<vmem>>
      %238 = tpu.memref_slice %arg7[%118] : memref<2x!tpu.dma_semaphore, #tpu.memory_space<semaphore_mem>> -> memref<1x!tpu.dma_semaphore, #tpu.memory_space<semaphore_mem>>
      %239 = tpu.memref_squeeze %238 : memref<1x!tpu.dma_semaphore, #tpu.memory_space<semaphore_mem>> -> memref<!tpu.dma_semaphore, #tpu.memory_space<semaphore_mem>>
      tpu.enqueue_dma source(%235 : memref<1x128xf32, #tpu.memory_space<any>>) target(%237 : memref<1x128xf32, #tpu.memory_space<vmem>>) target_semaphore(%239 : memref<!tpu.dma_semaphore, #tpu.memory_space<semaphore_mem>>)
      %c12_i32_145 = arith.constant 12 : i32
      %240 = arith.addi %119, %c12_i32_145 : i32
      %241 = arith.index_cast %240 : i32 to index
      %242 = memref.load %arg2[%241] : memref<32xi32, #tpu.memory_space<smem>>
      %c0_i32_146 = arith.constant 0 : i32
      %243 = arith.maxsi %242, %c0_i32_146 : i32
      %c1023_i32_147 = arith.constant 1023 : i32
      %244 = arith.minsi %243, %c1023_i32_147 : i32
      %c0_i32_148 = arith.constant 0 : i32
      %245 = tpu.memref_slice %arg3[%244, %c0_i32_148] : memref<1024x128xf32, #tpu.memory_space<any>> -> memref<1x128xf32, #tpu.memory_space<any>>
      %c12_i32_149 = arith.constant 12 : i32
      %c0_i32_150 = arith.constant 0 : i32
      %246 = tpu.memref_slice %arg6[%118, %c12_i32_149, %c0_i32_150] : memref<2x16x128xf32, #tpu.memory_space<vmem>> -> memref<1x1x128xf32, #tpu.memory_space<vmem>>
      %247 = tpu.memref_squeeze %246 : memref<1x1x128xf32, #tpu.memory_space<vmem>> -> memref<1x128xf32, #tpu.memory_space<vmem>>
      %248 = tpu.memref_slice %arg7[%118] : memref<2x!tpu.dma_semaphore, #tpu.memory_space<semaphore_mem>> -> memref<1x!tpu.dma_semaphore, #tpu.memory_space<semaphore_mem>>
      %249 = tpu.memref_squeeze %248 : memref<1x!tpu.dma_semaphore, #tpu.memory_space<semaphore_mem>> -> memref<!tpu.dma_semaphore, #tpu.memory_space<semaphore_mem>>
      tpu.enqueue_dma source(%245 : memref<1x128xf32, #tpu.memory_space<any>>) target(%247 : memref<1x128xf32, #tpu.memory_space<vmem>>) target_semaphore(%249 : memref<!tpu.dma_semaphore, #tpu.memory_space<semaphore_mem>>)
      %c13_i32_151 = arith.constant 13 : i32
      %250 = arith.addi %119, %c13_i32_151 : i32
      %251 = arith.index_cast %250 : i32 to index
      %252 = memref.load %arg2[%251] : memref<32xi32, #tpu.memory_space<smem>>
      %c0_i32_152 = arith.constant 0 : i32
      %253 = arith.maxsi %252, %c0_i32_152 : i32
      %c1023_i32_153 = arith.constant 1023 : i32
      %254 = arith.minsi %253, %c1023_i32_153 : i32
      %c0_i32_154 = arith.constant 0 : i32
      %255 = tpu.memref_slice %arg3[%254, %c0_i32_154] : memref<1024x128xf32, #tpu.memory_space<any>> -> memref<1x128xf32, #tpu.memory_space<any>>
      %c13_i32_155 = arith.constant 13 : i32
      %c0_i32_156 = arith.constant 0 : i32
      %256 = tpu.memref_slice %arg6[%118, %c13_i32_155, %c0_i32_156] : memref<2x16x128xf32, #tpu.memory_space<vmem>> -> memref<1x1x128xf32, #tpu.memory_space<vmem>>
      %257 = tpu.memref_squeeze %256 : memref<1x1x128xf32, #tpu.memory_space<vmem>> -> memref<1x128xf32, #tpu.memory_space<vmem>>
      %258 = tpu.memref_slice %arg7[%118] : memref<2x!tpu.dma_semaphore, #tpu.memory_space<semaphore_mem>> -> memref<1x!tpu.dma_semaphore, #tpu.memory_space<semaphore_mem>>
      %259 = tpu.memref_squeeze %258 : memref<1x!tpu.dma_semaphore, #tpu.memory_space<semaphore_mem>> -> memref<!tpu.dma_semaphore, #tpu.memory_space<semaphore_mem>>
      tpu.enqueue_dma source(%255 : memref<1x128xf32, #tpu.memory_space<any>>) target(%257 : memref<1x128xf32, #tpu.memory_space<vmem>>) target_semaphore(%259 : memref<!tpu.dma_semaphore, #tpu.memory_space<semaphore_mem>>)
      %c14_i32_157 = arith.constant 14 : i32
      %260 = arith.addi %119, %c14_i32_157 : i32
      %261 = arith.index_cast %260 : i32 to index
      %262 = memref.load %arg2[%261] : memref<32xi32, #tpu.memory_space<smem>>
      %c0_i32_158 = arith.constant 0 : i32
      %263 = arith.maxsi %262, %c0_i32_158 : i32
      %c1023_i32_159 = arith.constant 1023 : i32
      %264 = arith.minsi %263, %c1023_i32_159 : i32
      %c0_i32_160 = arith.constant 0 : i32
      %265 = tpu.memref_slice %arg3[%264, %c0_i32_160] : memref<1024x128xf32, #tpu.memory_space<any>> -> memref<1x128xf32, #tpu.memory_space<any>>
      %c14_i32_161 = arith.constant 14 : i32
      %c0_i32_162 = arith.constant 0 : i32
      %266 = tpu.memref_slice %arg6[%118, %c14_i32_161, %c0_i32_162] : memref<2x16x128xf32, #tpu.memory_space<vmem>> -> memref<1x1x128xf32, #tpu.memory_space<vmem>>
      %267 = tpu.memref_squeeze %266 : memref<1x1x128xf32, #tpu.memory_space<vmem>> -> memref<1x128xf32, #tpu.memory_space<vmem>>
      %268 = tpu.memref_slice %arg7[%118] : memref<2x!tpu.dma_semaphore, #tpu.memory_space<semaphore_mem>> -> memref<1x!tpu.dma_semaphore, #tpu.memory_space<semaphore_mem>>
      %269 = tpu.memref_squeeze %268 : memref<1x!tpu.dma_semaphore, #tpu.memory_space<semaphore_mem>> -> memref<!tpu.dma_semaphore, #tpu.memory_space<semaphore_mem>>
      tpu.enqueue_dma source(%265 : memref<1x128xf32, #tpu.memory_space<any>>) target(%267 : memref<1x128xf32, #tpu.memory_space<vmem>>) target_semaphore(%269 : memref<!tpu.dma_semaphore, #tpu.memory_space<semaphore_mem>>)
      %c15_i32_163 = arith.constant 15 : i32
      %270 = arith.addi %119, %c15_i32_163 : i32
      %271 = arith.index_cast %270 : i32 to index
      %272 = memref.load %arg2[%271] : memref<32xi32, #tpu.memory_space<smem>>
      %c0_i32_164 = arith.constant 0 : i32
      %273 = arith.maxsi %272, %c0_i32_164 : i32
      %c1023_i32_165 = arith.constant 1023 : i32
      %274 = arith.minsi %273, %c1023_i32_165 : i32
      %c0_i32_166 = arith.constant 0 : i32
      %275 = tpu.memref_slice %arg3[%274, %c0_i32_166] : memref<1024x128xf32, #tpu.memory_space<any>> -> memref<1x128xf32, #tpu.memory_space<any>>
      %c15_i32_167 = arith.constant 15 : i32
      %c0_i32_168 = arith.constant 0 : i32
      %276 = tpu.memref_slice %arg6[%118, %c15_i32_167, %c0_i32_168] : memref<2x16x128xf32, #tpu.memory_space<vmem>> -> memref<1x1x128xf32, #tpu.memory_space<vmem>>
      %277 = tpu.memref_squeeze %276 : memref<1x1x128xf32, #tpu.memory_space<vmem>> -> memref<1x128xf32, #tpu.memory_space<vmem>>
      %278 = tpu.memref_slice %arg7[%118] : memref<2x!tpu.dma_semaphore, #tpu.memory_space<semaphore_mem>> -> memref<1x!tpu.dma_semaphore, #tpu.memory_space<semaphore_mem>>
      %279 = tpu.memref_squeeze %278 : memref<1x!tpu.dma_semaphore, #tpu.memory_space<semaphore_mem>> -> memref<!tpu.dma_semaphore, #tpu.memory_space<semaphore_mem>>
      tpu.enqueue_dma source(%275 : memref<1x128xf32, #tpu.memory_space<any>>) target(%277 : memref<1x128xf32, #tpu.memory_space<vmem>>) target_semaphore(%279 : memref<!tpu.dma_semaphore, #tpu.memory_space<semaphore_mem>>)
    } else {
    }
    %c2_i32_3 = arith.constant 2 : i32
    %c0_i32_4 = arith.constant 0 : i32
    %8 = arith.cmpi eq, %c2_i32_3, %c0_i32_4 : i32
    %c1_i32_5 = arith.constant 1 : i32
    %9 = arith.select %8, %c1_i32_5, %c2_i32_3 : i32
    %10 = arith.remsi %arg1, %9 : i32
    %c0_i32_6 = arith.constant 0 : i32
    %11 = arith.cmpi ne, %10, %c0_i32_6 : i32
    %c0_i32_7 = arith.constant 0 : i32
    %12 = arith.cmpi slt, %10, %c0_i32_7 : i32
    %c0_i32_8 = arith.constant 0 : i32
    %13 = arith.cmpi slt, %9, %c0_i32_8 : i32
    %14 = arith.xori %12, %13 : i1
    %15 = arith.andi %14, %11 : i1
    %16 = arith.addi %10, %9 : i32
    %17 = arith.select %15, %16, %10 : i32
    %c0_i32_9 = arith.constant 0 : i32
    %c0_i32_10 = arith.constant 0 : i32
    %18 = tpu.memref_slice %arg3[%c0_i32_9, %c0_i32_10] : memref<1024x128xf32, #tpu.memory_space<any>> -> memref<1x128xf32, #tpu.memory_space<any>>
    %c0_i32_11 = arith.constant 0 : i32
    %c0_i32_12 = arith.constant 0 : i32
    %19 = tpu.memref_slice %arg6[%17, %c0_i32_11, %c0_i32_12] : memref<2x16x128xf32, #tpu.memory_space<vmem>> -> memref<1x1x128xf32, #tpu.memory_space<vmem>>
    %20 = tpu.memref_squeeze %19 : memref<1x1x128xf32, #tpu.memory_space<vmem>> -> memref<1x128xf32, #tpu.memory_space<vmem>>
    %21 = tpu.memref_slice %arg7[%17] : memref<2x!tpu.dma_semaphore, #tpu.memory_space<semaphore_mem>> -> memref<1x!tpu.dma_semaphore, #tpu.memory_space<semaphore_mem>>
    %22 = tpu.memref_squeeze %21 : memref<1x!tpu.dma_semaphore, #tpu.memory_space<semaphore_mem>> -> memref<!tpu.dma_semaphore, #tpu.memory_space<semaphore_mem>>
    tpu.wait_dma2 semaphore(%22 : memref<!tpu.dma_semaphore, #tpu.memory_space<semaphore_mem>>) src(%18 : memref<1x128xf32, #tpu.memory_space<any>>) dst(%20 : memref<1x128xf32, #tpu.memory_space<vmem>>)
    %c0_i32_13 = arith.constant 0 : i32
    %c0_i32_14 = arith.constant 0 : i32
    %23 = tpu.memref_slice %arg3[%c0_i32_13, %c0_i32_14] : memref<1024x128xf32, #tpu.memory_space<any>> -> memref<1x128xf32, #tpu.memory_space<any>>
    %c1_i32_15 = arith.constant 1 : i32
    %c0_i32_16 = arith.constant 0 : i32
    %24 = tpu.memref_slice %arg6[%17, %c1_i32_15, %c0_i32_16] : memref<2x16x128xf32, #tpu.memory_space<vmem>> -> memref<1x1x128xf32, #tpu.memory_space<vmem>>
    %25 = tpu.memref_squeeze %24 : memref<1x1x128xf32, #tpu.memory_space<vmem>> -> memref<1x128xf32, #tpu.memory_space<vmem>>
    %26 = tpu.memref_slice %arg7[%17] : memref<2x!tpu.dma_semaphore, #tpu.memory_space<semaphore_mem>> -> memref<1x!tpu.dma_semaphore, #tpu.memory_space<semaphore_mem>>
    %27 = tpu.memref_squeeze %26 : memref<1x!tpu.dma_semaphore, #tpu.memory_space<semaphore_mem>> -> memref<!tpu.dma_semaphore, #tpu.memory_space<semaphore_mem>>
    tpu.wait_dma2 semaphore(%27 : memref<!tpu.dma_semaphore, #tpu.memory_space<semaphore_mem>>) src(%23 : memref<1x128xf32, #tpu.memory_space<any>>) dst(%25 : memref<1x128xf32, #tpu.memory_space<vmem>>)
    %c0_i32_17 = arith.constant 0 : i32
    %c0_i32_18 = arith.constant 0 : i32
    %28 = tpu.memref_slice %arg3[%c0_i32_17, %c0_i32_18] : memref<1024x128xf32, #tpu.memory_space<any>> -> memref<1x128xf32, #tpu.memory_space<any>>
    %c2_i32_19 = arith.constant 2 : i32
    %c0_i32_20 = arith.constant 0 : i32
    %29 = tpu.memref_slice %arg6[%17, %c2_i32_19, %c0_i32_20] : memref<2x16x128xf32, #tpu.memory_space<vmem>> -> memref<1x1x128xf32, #tpu.memory_space<vmem>>
    %30 = tpu.memref_squeeze %29 : memref<1x1x128xf32, #tpu.memory_space<vmem>> -> memref<1x128xf32, #tpu.memory_space<vmem>>
    %31 = tpu.memref_slice %arg7[%17] : memref<2x!tpu.dma_semaphore, #tpu.memory_space<semaphore_mem>> -> memref<1x!tpu.dma_semaphore, #tpu.memory_space<semaphore_mem>>
    %32 = tpu.memref_squeeze %31 : memref<1x!tpu.dma_semaphore, #tpu.memory_space<semaphore_mem>> -> memref<!tpu.dma_semaphore, #tpu.memory_space<semaphore_mem>>
    tpu.wait_dma2 semaphore(%32 : memref<!tpu.dma_semaphore, #tpu.memory_space<semaphore_mem>>) src(%28 : memref<1x128xf32, #tpu.memory_space<any>>) dst(%30 : memref<1x128xf32, #tpu.memory_space<vmem>>)
    %c0_i32_21 = arith.constant 0 : i32
    %c0_i32_22 = arith.constant 0 : i32
    %33 = tpu.memref_slice %arg3[%c0_i32_21, %c0_i32_22] : memref<1024x128xf32, #tpu.memory_space<any>> -> memref<1x128xf32, #tpu.memory_space<any>>
    %c3_i32 = arith.constant 3 : i32
    %c0_i32_23 = arith.constant 0 : i32
    %34 = tpu.memref_slice %arg6[%17, %c3_i32, %c0_i32_23] : memref<2x16x128xf32, #tpu.memory_space<vmem>> -> memref<1x1x128xf32, #tpu.memory_space<vmem>>
    %35 = tpu.memref_squeeze %34 : memref<1x1x128xf32, #tpu.memory_space<vmem>> -> memref<1x128xf32, #tpu.memory_space<vmem>>
    %36 = tpu.memref_slice %arg7[%17] : memref<2x!tpu.dma_semaphore, #tpu.memory_space<semaphore_mem>> -> memref<1x!tpu.dma_semaphore, #tpu.memory_space<semaphore_mem>>
    %37 = tpu.memref_squeeze %36 : memref<1x!tpu.dma_semaphore, #tpu.memory_space<semaphore_mem>> -> memref<!tpu.dma_semaphore, #tpu.memory_space<semaphore_mem>>
    tpu.wait_dma2 semaphore(%37 : memref<!tpu.dma_semaphore, #tpu.memory_space<semaphore_mem>>) src(%33 : memref<1x128xf32, #tpu.memory_space<any>>) dst(%35 : memref<1x128xf32, #tpu.memory_space<vmem>>)
    %c0_i32_24 = arith.constant 0 : i32
    %c0_i32_25 = arith.constant 0 : i32
    %38 = tpu.memref_slice %arg3[%c0_i32_24, %c0_i32_25] : memref<1024x128xf32, #tpu.memory_space<any>> -> memref<1x128xf32, #tpu.memory_space<any>>
    %c4_i32 = arith.constant 4 : i32
    %c0_i32_26 = arith.constant 0 : i32
    %39 = tpu.memref_slice %arg6[%17, %c4_i32, %c0_i32_26] : memref<2x16x128xf32, #tpu.memory_space<vmem>> -> memref<1x1x128xf32, #tpu.memory_space<vmem>>
    %40 = tpu.memref_squeeze %39 : memref<1x1x128xf32, #tpu.memory_space<vmem>> -> memref<1x128xf32, #tpu.memory_space<vmem>>
    %41 = tpu.memref_slice %arg7[%17] : memref<2x!tpu.dma_semaphore, #tpu.memory_space<semaphore_mem>> -> memref<1x!tpu.dma_semaphore, #tpu.memory_space<semaphore_mem>>
    %42 = tpu.memref_squeeze %41 : memref<1x!tpu.dma_semaphore, #tpu.memory_space<semaphore_mem>> -> memref<!tpu.dma_semaphore, #tpu.memory_space<semaphore_mem>>
    tpu.wait_dma2 semaphore(%42 : memref<!tpu.dma_semaphore, #tpu.memory_space<semaphore_mem>>) src(%38 : memref<1x128xf32, #tpu.memory_space<any>>) dst(%40 : memref<1x128xf32, #tpu.memory_space<vmem>>)
    %c0_i32_27 = arith.constant 0 : i32
    %c0_i32_28 = arith.constant 0 : i32
    %43 = tpu.memref_slice %arg3[%c0_i32_27, %c0_i32_28] : memref<1024x128xf32, #tpu.memory_space<any>> -> memref<1x128xf32, #tpu.memory_space<any>>
    %c5_i32 = arith.constant 5 : i32
    %c0_i32_29 = arith.constant 0 : i32
    %44 = tpu.memref_slice %arg6[%17, %c5_i32, %c0_i32_29] : memref<2x16x128xf32, #tpu.memory_space<vmem>> -> memref<1x1x128xf32, #tpu.memory_space<vmem>>
    %45 = tpu.memref_squeeze %44 : memref<1x1x128xf32, #tpu.memory_space<vmem>> -> memref<1x128xf32, #tpu.memory_space<vmem>>
    %46 = tpu.memref_slice %arg7[%17] : memref<2x!tpu.dma_semaphore, #tpu.memory_space<semaphore_mem>> -> memref<1x!tpu.dma_semaphore, #tpu.memory_space<semaphore_mem>>
    %47 = tpu.memref_squeeze %46 : memref<1x!tpu.dma_semaphore, #tpu.memory_space<semaphore_mem>> -> memref<!tpu.dma_semaphore, #tpu.memory_space<semaphore_mem>>
    tpu.wait_dma2 semaphore(%47 : memref<!tpu.dma_semaphore, #tpu.memory_space<semaphore_mem>>) src(%43 : memref<1x128xf32, #tpu.memory_space<any>>) dst(%45 : memref<1x128xf32, #tpu.memory_space<vmem>>)
    %c0_i32_30 = arith.constant 0 : i32
    %c0_i32_31 = arith.constant 0 : i32
    %48 = tpu.memref_slice %arg3[%c0_i32_30, %c0_i32_31] : memref<1024x128xf32, #tpu.memory_space<any>> -> memref<1x128xf32, #tpu.memory_space<any>>
    %c6_i32 = arith.constant 6 : i32
    %c0_i32_32 = arith.constant 0 : i32
    %49 = tpu.memref_slice %arg6[%17, %c6_i32, %c0_i32_32] : memref<2x16x128xf32, #tpu.memory_space<vmem>> -> memref<1x1x128xf32, #tpu.memory_space<vmem>>
    %50 = tpu.memref_squeeze %49 : memref<1x1x128xf32, #tpu.memory_space<vmem>> -> memref<1x128xf32, #tpu.memory_space<vmem>>
    %51 = tpu.memref_slice %arg7[%17] : memref<2x!tpu.dma_semaphore, #tpu.memory_space<semaphore_mem>> -> memref<1x!tpu.dma_semaphore, #tpu.memory_space<semaphore_mem>>
    %52 = tpu.memref_squeeze %51 : memref<1x!tpu.dma_semaphore, #tpu.memory_space<semaphore_mem>> -> memref<!tpu.dma_semaphore, #tpu.memory_space<semaphore_mem>>
    tpu.wait_dma2 semaphore(%52 : memref<!tpu.dma_semaphore, #tpu.memory_space<semaphore_mem>>) src(%48 : memref<1x128xf32, #tpu.memory_space<any>>) dst(%50 : memref<1x128xf32, #tpu.memory_space<vmem>>)
    %c0_i32_33 = arith.constant 0 : i32
    %c0_i32_34 = arith.constant 0 : i32
    %53 = tpu.memref_slice %arg3[%c0_i32_33, %c0_i32_34] : memref<1024x128xf32, #tpu.memory_space<any>> -> memref<1x128xf32, #tpu.memory_space<any>>
    %c7_i32 = arith.constant 7 : i32
    %c0_i32_35 = arith.constant 0 : i32
    %54 = tpu.memref_slice %arg6[%17, %c7_i32, %c0_i32_35] : memref<2x16x128xf32, #tpu.memory_space<vmem>> -> memref<1x1x128xf32, #tpu.memory_space<vmem>>
    %55 = tpu.memref_squeeze %54 : memref<1x1x128xf32, #tpu.memory_space<vmem>> -> memref<1x128xf32, #tpu.memory_space<vmem>>
    %56 = tpu.memref_slice %arg7[%17] : memref<2x!tpu.dma_semaphore, #tpu.memory_space<semaphore_mem>> -> memref<1x!tpu.dma_semaphore, #tpu.memory_space<semaphore_mem>>
    %57 = tpu.memref_squeeze %56 : memref<1x!tpu.dma_semaphore, #tpu.memory_space<semaphore_mem>> -> memref<!tpu.dma_semaphore, #tpu.memory_space<semaphore_mem>>
    tpu.wait_dma2 semaphore(%57 : memref<!tpu.dma_semaphore, #tpu.memory_space<semaphore_mem>>) src(%53 : memref<1x128xf32, #tpu.memory_space<any>>) dst(%55 : memref<1x128xf32, #tpu.memory_space<vmem>>)
    %c0_i32_36 = arith.constant 0 : i32
    %c0_i32_37 = arith.constant 0 : i32
    %58 = tpu.memref_slice %arg3[%c0_i32_36, %c0_i32_37] : memref<1024x128xf32, #tpu.memory_space<any>> -> memref<1x128xf32, #tpu.memory_space<any>>
    %c8_i32 = arith.constant 8 : i32
    %c0_i32_38 = arith.constant 0 : i32
    %59 = tpu.memref_slice %arg6[%17, %c8_i32, %c0_i32_38] : memref<2x16x128xf32, #tpu.memory_space<vmem>> -> memref<1x1x128xf32, #tpu.memory_space<vmem>>
    %60 = tpu.memref_squeeze %59 : memref<1x1x128xf32, #tpu.memory_space<vmem>> -> memref<1x128xf32, #tpu.memory_space<vmem>>
    %61 = tpu.memref_slice %arg7[%17] : memref<2x!tpu.dma_semaphore, #tpu.memory_space<semaphore_mem>> -> memref<1x!tpu.dma_semaphore, #tpu.memory_space<semaphore_mem>>
    %62 = tpu.memref_squeeze %61 : memref<1x!tpu.dma_semaphore, #tpu.memory_space<semaphore_mem>> -> memref<!tpu.dma_semaphore, #tpu.memory_space<semaphore_mem>>
    tpu.wait_dma2 semaphore(%62 : memref<!tpu.dma_semaphore, #tpu.memory_space<semaphore_mem>>) src(%58 : memref<1x128xf32, #tpu.memory_space<any>>) dst(%60 : memref<1x128xf32, #tpu.memory_space<vmem>>)
    %c0_i32_39 = arith.constant 0 : i32
    %c0_i32_40 = arith.constant 0 : i32
    %63 = tpu.memref_slice %arg3[%c0_i32_39, %c0_i32_40] : memref<1024x128xf32, #tpu.memory_space<any>> -> memref<1x128xf32, #tpu.memory_space<any>>
    %c9_i32 = arith.constant 9 : i32
    %c0_i32_41 = arith.constant 0 : i32
    %64 = tpu.memref_slice %arg6[%17, %c9_i32, %c0_i32_41] : memref<2x16x128xf32, #tpu.memory_space<vmem>> -> memref<1x1x128xf32, #tpu.memory_space<vmem>>
    %65 = tpu.memref_squeeze %64 : memref<1x1x128xf32, #tpu.memory_space<vmem>> -> memref<1x128xf32, #tpu.memory_space<vmem>>
    %66 = tpu.memref_slice %arg7[%17] : memref<2x!tpu.dma_semaphore, #tpu.memory_space<semaphore_mem>> -> memref<1x!tpu.dma_semaphore, #tpu.memory_space<semaphore_mem>>
    %67 = tpu.memref_squeeze %66 : memref<1x!tpu.dma_semaphore, #tpu.memory_space<semaphore_mem>> -> memref<!tpu.dma_semaphore, #tpu.memory_space<semaphore_mem>>
    tpu.wait_dma2 semaphore(%67 : memref<!tpu.dma_semaphore, #tpu.memory_space<semaphore_mem>>) src(%63 : memref<1x128xf32, #tpu.memory_space<any>>) dst(%65 : memref<1x128xf32, #tpu.memory_space<vmem>>)
    %c0_i32_42 = arith.constant 0 : i32
    %c0_i32_43 = arith.constant 0 : i32
    %68 = tpu.memref_slice %arg3[%c0_i32_42, %c0_i32_43] : memref<1024x128xf32, #tpu.memory_space<any>> -> memref<1x128xf32, #tpu.memory_space<any>>
    %c10_i32 = arith.constant 10 : i32
    %c0_i32_44 = arith.constant 0 : i32
    %69 = tpu.memref_slice %arg6[%17, %c10_i32, %c0_i32_44] : memref<2x16x128xf32, #tpu.memory_space<vmem>> -> memref<1x1x128xf32, #tpu.memory_space<vmem>>
    %70 = tpu.memref_squeeze %69 : memref<1x1x128xf32, #tpu.memory_space<vmem>> -> memref<1x128xf32, #tpu.memory_space<vmem>>
    %71 = tpu.memref_slice %arg7[%17] : memref<2x!tpu.dma_semaphore, #tpu.memory_space<semaphore_mem>> -> memref<1x!tpu.dma_semaphore, #tpu.memory_space<semaphore_mem>>
    %72 = tpu.memref_squeeze %71 : memref<1x!tpu.dma_semaphore, #tpu.memory_space<semaphore_mem>> -> memref<!tpu.dma_semaphore, #tpu.memory_space<semaphore_mem>>
    tpu.wait_dma2 semaphore(%72 : memref<!tpu.dma_semaphore, #tpu.memory_space<semaphore_mem>>) src(%68 : memref<1x128xf32, #tpu.memory_space<any>>) dst(%70 : memref<1x128xf32, #tpu.memory_space<vmem>>)
    %c0_i32_45 = arith.constant 0 : i32
    %c0_i32_46 = arith.constant 0 : i32
    %73 = tpu.memref_slice %arg3[%c0_i32_45, %c0_i32_46] : memref<1024x128xf32, #tpu.memory_space<any>> -> memref<1x128xf32, #tpu.memory_space<any>>
    %c11_i32 = arith.constant 11 : i32
    %c0_i32_47 = arith.constant 0 : i32
    %74 = tpu.memref_slice %arg6[%17, %c11_i32, %c0_i32_47] : memref<2x16x128xf32, #tpu.memory_space<vmem>> -> memref<1x1x128xf32, #tpu.memory_space<vmem>>
    %75 = tpu.memref_squeeze %74 : memref<1x1x128xf32, #tpu.memory_space<vmem>> -> memref<1x128xf32, #tpu.memory_space<vmem>>
    %76 = tpu.memref_slice %arg7[%17] : memref<2x!tpu.dma_semaphore, #tpu.memory_space<semaphore_mem>> -> memref<1x!tpu.dma_semaphore, #tpu.memory_space<semaphore_mem>>
    %77 = tpu.memref_squeeze %76 : memref<1x!tpu.dma_semaphore, #tpu.memory_space<semaphore_mem>> -> memref<!tpu.dma_semaphore, #tpu.memory_space<semaphore_mem>>
    tpu.wait_dma2 semaphore(%77 : memref<!tpu.dma_semaphore, #tpu.memory_space<semaphore_mem>>) src(%73 : memref<1x128xf32, #tpu.memory_space<any>>) dst(%75 : memref<1x128xf32, #tpu.memory_space<vmem>>)
    %c0_i32_48 = arith.constant 0 : i32
    %c0_i32_49 = arith.constant 0 : i32
    %78 = tpu.memref_slice %arg3[%c0_i32_48, %c0_i32_49] : memref<1024x128xf32, #tpu.memory_space<any>> -> memref<1x128xf32, #tpu.memory_space<any>>
    %c12_i32 = arith.constant 12 : i32
    %c0_i32_50 = arith.constant 0 : i32
    %79 = tpu.memref_slice %arg6[%17, %c12_i32, %c0_i32_50] : memref<2x16x128xf32, #tpu.memory_space<vmem>> -> memref<1x1x128xf32, #tpu.memory_space<vmem>>
    %80 = tpu.memref_squeeze %79 : memref<1x1x128xf32, #tpu.memory_space<vmem>> -> memref<1x128xf32, #tpu.memory_space<vmem>>
    %81 = tpu.memref_slice %arg7[%17] : memref<2x!tpu.dma_semaphore, #tpu.memory_space<semaphore_mem>> -> memref<1x!tpu.dma_semaphore, #tpu.memory_space<semaphore_mem>>
    %82 = tpu.memref_squeeze %81 : memref<1x!tpu.dma_semaphore, #tpu.memory_space<semaphore_mem>> -> memref<!tpu.dma_semaphore, #tpu.memory_space<semaphore_mem>>
    tpu.wait_dma2 semaphore(%82 : memref<!tpu.dma_semaphore, #tpu.memory_space<semaphore_mem>>) src(%78 : memref<1x128xf32, #tpu.memory_space<any>>) dst(%80 : memref<1x128xf32, #tpu.memory_space<vmem>>)
    %c0_i32_51 = arith.constant 0 : i32
    %c0_i32_52 = arith.constant 0 : i32
    %83 = tpu.memref_slice %arg3[%c0_i32_51, %c0_i32_52] : memref<1024x128xf32, #tpu.memory_space<any>> -> memref<1x128xf32, #tpu.memory_space<any>>
    %c13_i32 = arith.constant 13 : i32
    %c0_i32_53 = arith.constant 0 : i32
    %84 = tpu.memref_slice %arg6[%17, %c13_i32, %c0_i32_53] : memref<2x16x128xf32, #tpu.memory_space<vmem>> -> memref<1x1x128xf32, #tpu.memory_space<vmem>>
    %85 = tpu.memref_squeeze %84 : memref<1x1x128xf32, #tpu.memory_space<vmem>> -> memref<1x128xf32, #tpu.memory_space<vmem>>
    %86 = tpu.memref_slice %arg7[%17] : memref<2x!tpu.dma_semaphore, #tpu.memory_space<semaphore_mem>> -> memref<1x!tpu.dma_semaphore, #tpu.memory_space<semaphore_mem>>
    %87 = tpu.memref_squeeze %86 : memref<1x!tpu.dma_semaphore, #tpu.memory_space<semaphore_mem>> -> memref<!tpu.dma_semaphore, #tpu.memory_space<semaphore_mem>>
    tpu.wait_dma2 semaphore(%87 : memref<!tpu.dma_semaphore, #tpu.memory_space<semaphore_mem>>) src(%83 : memref<1x128xf32, #tpu.memory_space<any>>) dst(%85 : memref<1x128xf32, #tpu.memory_space<vmem>>)
    %c0_i32_54 = arith.constant 0 : i32
    %c0_i32_55 = arith.constant 0 : i32
    %88 = tpu.memref_slice %arg3[%c0_i32_54, %c0_i32_55] : memref<1024x128xf32, #tpu.memory_space<any>> -> memref<1x128xf32, #tpu.memory_space<any>>
    %c14_i32 = arith.constant 14 : i32
    %c0_i32_56 = arith.constant 0 : i32
    %89 = tpu.memref_slice %arg6[%17, %c14_i32, %c0_i32_56] : memref<2x16x128xf32, #tpu.memory_space<vmem>> -> memref<1x1x128xf32, #tpu.memory_space<vmem>>
    %90 = tpu.memref_squeeze %89 : memref<1x1x128xf32, #tpu.memory_space<vmem>> -> memref<1x128xf32, #tpu.memory_space<vmem>>
    %91 = tpu.memref_slice %arg7[%17] : memref<2x!tpu.dma_semaphore, #tpu.memory_space<semaphore_mem>> -> memref<1x!tpu.dma_semaphore, #tpu.memory_space<semaphore_mem>>
    %92 = tpu.memref_squeeze %91 : memref<1x!tpu.dma_semaphore, #tpu.memory_space<semaphore_mem>> -> memref<!tpu.dma_semaphore, #tpu.memory_space<semaphore_mem>>
    tpu.wait_dma2 semaphore(%92 : memref<!tpu.dma_semaphore, #tpu.memory_space<semaphore_mem>>) src(%88 : memref<1x128xf32, #tpu.memory_space<any>>) dst(%90 : memref<1x128xf32, #tpu.memory_space<vmem>>)
    %c0_i32_57 = arith.constant 0 : i32
    %c0_i32_58 = arith.constant 0 : i32
    %93 = tpu.memref_slice %arg3[%c0_i32_57, %c0_i32_58] : memref<1024x128xf32, #tpu.memory_space<any>> -> memref<1x128xf32, #tpu.memory_space<any>>
    %c15_i32 = arith.constant 15 : i32
    %c0_i32_59 = arith.constant 0 : i32
    %94 = tpu.memref_slice %arg6[%17, %c15_i32, %c0_i32_59] : memref<2x16x128xf32, #tpu.memory_space<vmem>> -> memref<1x1x128xf32, #tpu.memory_space<vmem>>
    %95 = tpu.memref_squeeze %94 : memref<1x1x128xf32, #tpu.memory_space<vmem>> -> memref<1x128xf32, #tpu.memory_space<vmem>>
    %96 = tpu.memref_slice %arg7[%17] : memref<2x!tpu.dma_semaphore, #tpu.memory_space<semaphore_mem>> -> memref<1x!tpu.dma_semaphore, #tpu.memory_space<semaphore_mem>>
    %97 = tpu.memref_squeeze %96 : memref<1x!tpu.dma_semaphore, #tpu.memory_space<semaphore_mem>> -> memref<!tpu.dma_semaphore, #tpu.memory_space<semaphore_mem>>
    tpu.wait_dma2 semaphore(%97 : memref<!tpu.dma_semaphore, #tpu.memory_space<semaphore_mem>>) src(%93 : memref<1x128xf32, #tpu.memory_space<any>>) dst(%95 : memref<1x128xf32, #tpu.memory_space<vmem>>)
    %98 = arith.index_cast %17 : i32 to index
    %c0 = arith.constant 0 : index
    %c0_60 = arith.constant 0 : index
    %99 = vector.load %arg6[%98, %c0, %c0_60] : memref<2x16x128xf32, #tpu.memory_space<vmem>>, vector<1x16x128xf32>
    %100 = vector.shape_cast %99 : vector<1x16x128xf32> to vector<16x128xf32>
    %c0_61 = arith.constant 0 : index
    %c0_62 = arith.constant 0 : index
    %101 = vector.load %arg4[%c0_61, %c0_62] : memref<16x128xf32, #tpu.memory_space<vmem>>, vector<16x128xf32>
    %102 = arith.addf %100, %101 : vector<16x128xf32>
    %c0_63 = arith.constant 0 : index
    %c0_64 = arith.constant 0 : index
    %c0_65 = arith.constant 0 : index
    %103 = vector.load %arg5[%c0_63, %c0_64, %c0_65] : memref<1x16x128xf32, #tpu.memory_space<vmem>>, vector<1x16x128xf32>
    %104 = vector.shape_cast %103 : vector<1x16x128xf32> to vector<16x128xf32>
    %105 = vector.shape_cast %102 : vector<16x128xf32> to vector<1x16x128xf32>
    tpu.vector_store %arg5[%c0_63, %c0_64, %c0_65], %105 {strides = array<i32>} : memref<1x16x128xf32, #tpu.memory_space<vmem>>, vector<1x16x128xf32>,
    return
  }
  func.func @transform_1(%arg0: i32, %arg1: i32, %arg2: memref<32xi32, #tpu.memory_space<smem>>) -> (i32, i32) {
    %c0_i32 = arith.constant 0 : i32
    %c0_i32_0 = arith.constant 0 : i32
    %c0_i32_1 = arith.constant 0 : i32
    return %c0_i32, %c0_i32_0 : i32, i32
  }
  func.func @transform_2(%arg0: i32, %arg1: i32, %arg2: memref<32xi32, #tpu.memory_space<smem>>) -> (i32, i32, i32) {
    %c2_i32 = arith.constant 2 : i32
    %0 = arith.muli %arg0, %c2_i32 : i32
    %1 = arith.addi %0, %arg1 : i32
    %c0_i32 = arith.constant 0 : i32
    %c0_i32_0 = arith.constant 0 : i32
    %c0_i32_1 = arith.constant 0 : i32
    return %1, %c0_i32, %c0_i32_0 : i32, i32, i32
  }
}

</mosaic_0001>

<bundles_post_ra>
// kernel: tpu_custom_call.1
= control target key start
LH: loop header
LB: loop body
LE: loop exit
PB: predicated region body
PF: predicated region fallthrough
CT: control target
= control target key end

     0   :  { %s2361_s15 = smov [#allocation5]   ;;  %s3126_s0 = inlined_call_operand.hbm [shape: s32[32], index: 0, kind: input, shape index: {}]   ;;  %s3127_s1 = inlined_call_operand.hbm [shape: f32[1024,128], index: 1, kind: input, shape index: {}]   ;;  %s3128_s2 = inlined_call_operand.hbm [shape: f32[16,128], index: 2, kind: input, shape index: {}]   ;;  %s3129_s3 = inlined_call_operand.hbm [shape: f32[2,16,128], index: 3, kind: output, shape index: {}]  }
   0x1   :  { %3137 = sst [smem:[#allocation86_spill]] %s3128_s2  ;;  %s9_s14 = sshll.u32 %s3126_s0, 4  ;;  %s10_s14 = int_to_ptr.hbm [resolvable:$true] %s9_s14 }
   0x2   :  { %12 = dma.hbm_to_smem %s10_s14, 16, %s2361_s15, [#allocation4] }
   0x3   :  { %2325 = dma.done.wait [#allocation4], 16 }
   0x4   :  { %2326 = vsyncadd [#allocation4], 4294967280 }
   0x5   :  { %15 = sfence }
   0x6   :  { %16 = vsyncpa [#allocation7], 0 }
   0x7   :  { %17 = vsyncpa [#allocation8], 0 }
   0x8   :  { %19 = vsyncpa [#allocation8 + $0x1], 0  ;;  %s2407_s16 = smov 0   ;;  %s2409_s17 = smov 0  }
   0x9   :  { %s2411_s18 = smov 0   ;;  %s2413_s19 = smov 0  }
   0xa   :  { %s2415_s20 = smov 0   ;;  %s2417_s0 = smov 0  }
   0xb LB: > { %3138 = sst [smem:[#allocation80_spill]] %s2355_s20  ;;  %s1094_s21 = sadd.s32 4294967295, %s2359_s0   ;;  %s2359_s0 = sphi %s2417_s0, %s25_s0   ;;  %s2355_s20 = sphi %s2415_s20, %s3157_s20   ;;  %s2351_s19 = sphi %s2413_s19, %s3156_s19   ;;  %s2347_s18 = sphi %s2411_s18, %s3160_s18   ;;  %s2343_s17 = sphi %s2409_s17, %s3159_s17   ;;  %s2339_s16 = sphi %s2407_s16, %s3158_s16  }
   0xc   : > { %s1095_s22 = sadd.s32 4294967294, %s2359_s0   ;;  %s34_s23 = sadd.s32 1, %s2355_s20 }
   0xd   : > { %s69_s24 = sadd.s32 1, %s2347_s18  ;;  %p35_p0 = scmp.ge.s32.totalorder %s34_s23, 2 }
   0xe   : > { %p79_p1 = scmp.ne.s32.totalorder %s2347_s18, %s2343_s17  ;;  %p80_p2 = scmp.eq.s32.totalorder %s1094_s21, 1 }
   0xf   : > { %p85_p3 = scmp.ne.s32.totalorder %s2343_s17, %s2339_s16  ;;  %s3162_s23 = smov (%p35_p0, %s34_s23), 0 }
  0x10   : > { %3139 = sst [smem:[#allocation81_spill]] %s3162_s23  ;;  %p2447_p4 = por %p80_p2, %p79_p1 }
  0x11   : > { %p86_p5 = scmp.eq.s32.totalorder %s1095_s22, 1  ;;  %s66_s26 = ssub.s32 %s2355_s20, %s3162_s23 }
  0x12   : > { %p1096_p6 = scmp.ge.s32.totalorder %s2359_s0, 1  ;;  %p67_p7 = scmp.eq.s32.totalorder %s66_s26, 0 }
  0x13   : > { %p2454_p8 = por %p86_p5, %p85_p3  ;;  %p93_p9 = scmp.lt.s32.totalorder %s2359_s0, 3 }
  0x14   : > { %s2460_s28 = scalar_select %p67_p7, %s2347_s18, %s69_s24  }
  0x15   : > { %p94_p10 = pnand %p1096_p6, %p93_p9  ;;  %p1390_p11 = scmp.eq.s32.totalorder %s1094_s21, 0 }
  0x16   : > { %3142 = sst [smem:[#allocation82_spill]] %s2460_s28  ;;  %s2362_s5 = smov [#allocation6]  }
  0x17   : > { %s3143_s2 = sld [smem:[#allocation86_spill]]  ;;  %p1382_p12 = pneg %p94_p10 }
  0x18   : > { %s106_s6 = sshll.u32 %s2362_s5, 4  ;;  %s2363_s7 = smov 128   ;;  %s107_s6 = int_to_ptr.vmem [resolvable:$true] %s106_s6 }
  0x19   : > { %p1383_p13 = pnand %p1390_p11, %p1382_p12  ;;  %s2364_s8 = smov 8  }
  0x1a   : > { %122 = sbr.rel (%p94_p10) target bundleno = 721 (0x2d1), region = 24 }
  0x1d   : > { %s104_s4 = sshll.u32 %s3143_s2, 4  ;;  %s105_s4 = int_to_ptr.hbm [resolvable:$true] %s104_s4 }
  0x1e   : > { %1385 = dma.hbm_to_vmem [thread:$0]  (!%p1383_p13), %s105_s4, 256, %s107_s6, [#allocation7], %s2363_s7, %s2363_s7, %s2364_s8  }
  0x1f   : > { %2328 = dma.done.wait (%p1390_p11), [#allocation7], 256  }
  0x20   : > { %2330 = vsyncadd (%p1390_p11), [#allocation7], 4294967040  ;;  %s3130_s9 = sand.u32 1, %s2343_s17   ;;  %p1101_p0 = scmp.ne.s32.totalorder %s2351_s19, 0 }
  0x21   : > { %s1100_s10 = sshll.u32 %s3130_s9, 4 }
  0x22   : > { %s2468_s11 = scalar_lea.vmem [#allocation9], %s1100_s10  ;;  %144 = sbr.rel (%p1101_p0) target bundleno = 282 (0x11a), region = 32 }
  0x27   : > { %s146_s12 = sld [smem:[#allocation5]]  ;;  %s2365_s13 = smov [#allocation2]  }
  0x28   : > { %s2471_s14 = sshll.u32 %s2365_s13, 4  ;;  %s1107_s15 = sld [smem:[#allocation5 + $0x1]] }
  0x29   : > { %3144 = sst [smem:[#allocation83_spill]] %s2471_s14  ;;  %s2366_s21 = smov [#allocation2 + $0x1]  }
  0x2a   : > { %s2474_s22 = sshll.u32 %s2366_s21, 4  ;;  %s2476_s24 = sld [smem:[#allocation5 + $0x2]] }
  0x2b   : > { %3145 = sst [smem:[#allocation84_spill]] %s2474_s22  ;;  %s2367_s26 = smov [#allocation2 + $0x2]  }
  0x2c   : > { %s2479_s29 = sshll.u32 %s2367_s26, 4  ;;  %s2481_s30 = sld [smem:[#allocation5 + $0x3]]  ;;  %s204_s29 = int_to_ptr.vmem [resolvable:$true] %s2479_s29 }
  0x2d   : > { %p147_p1 = scmp.gt.s32.totalorder %s146_s12, 0  ;;  %p1102_p2 = scmp.lt.s32.totalorder %s146_s12, 1023 }
  0x2e   : > { %p167_p3 = scmp.gt.s32.totalorder %s1107_s15, 0  ;;  %p1108_p5 = scmp.lt.s32.totalorder %s1107_s15, 1023 }
  0x2f   : > { %s3164_s12 = smov (!%p147_p1, %s146_s12), 0  ;;  %s2493_s2 = scalar_lea.hbm %s3127_s1, 1024 }
  0x30   : > { %s3166_s15 = smov (!%p167_p3, %s1107_s15), 0  ;;  %s3168_s12 = smov (!%p1102_p2, %s3164_s12), 1023 }
  0x31   : > { %s3170_s15 = smov (!%p1108_p5, %s3166_s15), 1023  ;;  %s151_s6 = scalar_lea.hbm %s3127_s1, %s3168_s12 }
  0x32   : > { %p188_p6 = scmp.gt.s32.totalorder %s2476_s24, 0  ;;  %s159_s7 = sshll.u32 %s151_s6, 4  ;;  %s160_s7 = int_to_ptr.hbm [resolvable:$true] %s159_s7 }
  0x33   : > { %s171_s13 = scalar_lea.hbm %s3127_s1, %s3170_s15  ;;  %s1505_s26 = sshra.s32 %s160_s7, 4  ;;  %s1506_s26 = int_to_ptr.hbm [resolvable:$true] %s1505_s26 }
  0x34   : > { %s180_s21 = sshll.u32 %s171_s13, 4  ;;  %s1507_s9 = scalar_lea.hbm %s1506_s26, 1  ;;  %s181_s21 = int_to_ptr.hbm [resolvable:$true] %s180_s21 }
  0x35   : > { %p1508_p7 = scmp.ne.s32.totalorder %s1506_s26, %s1507_s9  ;;  %p1510_p9 = scmp.lt.s32.totalorder %s1506_s26, %s3127_s1 }
  0x36   : > { %p1511_p10 = scmp.lt.s32.totalorder %s2493_s2, %s1507_s9 }
  0x38   : > { %p1512_p11 = por %p1511_p10, %p1510_p9 }
  0x3a   : > { %p1513_p12 = pnand %p1512_p11, %p1508_p7 }
  0x3c   : > { %1516 = shalt.err (!%p1513_p12)  }
  0x3d   : > { %s3146_s12 = sld [smem:[#allocation83_spill]]  ;;  %p1114_p13 = scmp.lt.s32.totalorder %s2476_s24, 1023 }
  0x3e   : > { %s1529_s5 = sshra.s32 %s181_s21, 4  ;;  %s1530_s5 = int_to_ptr.hbm [resolvable:$true] %s1529_s5 }
  0x3f   : > { %s1531_s14 = scalar_lea.hbm %s1530_s5, 1  ;;  %p1534_p1 = scmp.lt.s32.totalorder %s1530_s5, %s3127_s1 }
  0x40   : > { %p1532_p0 = scmp.ne.s32.totalorder %s1530_s5, %s1531_s14  ;;  %p1535_p2 = scmp.lt.s32.totalorder %s2493_s2, %s1531_s14 }
  0x42   : > { %p1536_p3 = por %p1535_p2, %p1534_p1 }
  0x43   : > { %s3147_s15 = int_to_ptr.vmem [resolvable:$true] %s3146_s12 }
  0x44   : > { %164 = dma.hbm_to_vmem [thread:$0]  %s160_s7, 16, %s3147_s15, [#allocation3] }
  0x45   : > { %p1537_p5 = pnand %p1536_p3, %p1532_p0 }
  0x47   : > { %1540 = shalt.err (!%p1537_p5)  }
  0x48   : > { %s3148_s23 = sld [smem:[#allocation84_spill]]  ;;  %p209_p7 = scmp.gt.s32.totalorder %s2481_s30, 0 }
  0x49   : > { %s189_s7 = scalar_select %p188_p6, %s2476_s24, 0 }
  0x4a   : > { %s210_s8 = scalar_select %p209_p7, %s2481_s30, 0 }
  0x4b   : > { %s3172_s7 = smov (!%p1114_p13, %s189_s7), 1023  ;;  %p1120_p9 = scmp.lt.s32.totalorder %s2481_s30, 1023 }
  0x4c   : > { %s192_s26 = scalar_lea.hbm %s3127_s1, %s3172_s7  ;;  %s2368_s12 = smov [#allocation2 + $0x3]  }
  0x4d   : > { %s201_s4 = sshll.u32 %s192_s26, 4  ;;  %s2520_s15 = sshll.u32 %s2368_s12, 4  ;;  %s202_s4 = int_to_ptr.hbm [resolvable:$true] %s201_s4  ;;  %s225_s15 = int_to_ptr.vmem [resolvable:$true] %s2520_s15 }
  0x4e   : > { %s3149_s9 = int_to_ptr.vmem [resolvable:$true] %s3148_s23  ;;  %s1553_s5 = sshra.s32 %s202_s4, 4  ;;  %s1554_s5 = int_to_ptr.hbm [resolvable:$true] %s1553_s5 }
  0x4f   : > { %185 = dma.hbm_to_vmem [thread:$0]  %s181_s21, 16, %s3149_s9, [#allocation3] }
  0x50   : > { %s1555_s21 = scalar_lea.hbm %s1554_s5, 1  ;;  %p1558_p10 = scmp.lt.s32.totalorder %s1554_s5, %s3127_s1 }
  0x51   : > { %p1556_p6 = scmp.ne.s32.totalorder %s1554_s5, %s1555_s21  ;;  %p1559_p11 = scmp.lt.s32.totalorder %s2493_s2, %s1555_s21 }
  0x53   : > { %p1560_p12 = por %p1559_p11, %p1558_p10 }
  0x55   : > { %p1561_p13 = pnand %p1560_p12, %p1556_p6 }
  0x57   : > { %1564 = shalt.err (!%p1561_p13)  }
  0x58   : > { %206 = dma.hbm_to_vmem [thread:$0]  %s202_s4, 16, %s204_s29, [#allocation3] }
  0x59   : > { %s3174_s8 = smov (!%p1120_p9, %s210_s8), 1023  ;;  %s1125_s24 = sld [smem:[#allocation5 + $0x4]] }
  0x5a   : > { %s213_s9 = scalar_lea.hbm %s3127_s1, %s3174_s8  ;;  %s2369_s10 = smov [#allocation2 + $0x4]  }
  0x5b   : > { %s222_s7 = sshll.u32 %s213_s9, 4  ;;  %s2532_s13 = sshll.u32 %s2369_s10, 4  ;;  %s223_s7 = int_to_ptr.hbm [resolvable:$true] %s222_s7  ;;  %s246_s13 = int_to_ptr.vmem [resolvable:$true] %s2532_s13 }
  0x5c   : > { %s1577_s26 = sshra.s32 %s223_s7, 4  ;;  %s1578_s26 = int_to_ptr.hbm [resolvable:$true] %s1577_s26 }
  0x5d   : > { %s1579_s29 = scalar_lea.hbm %s1578_s26, 1  ;;  %p1582_p1 = scmp.lt.s32.totalorder %s1578_s26, %s3127_s1 }
  0x5e   : > { %p1580_p0 = scmp.ne.s32.totalorder %s1578_s26, %s1579_s29  ;;  %p1583_p2 = scmp.lt.s32.totalorder %s2493_s2, %s1579_s29 }
  0x60   : > { %p1584_p3 = por %p1583_p2, %p1582_p1 }
  0x62   : > { %p1585_p5 = pnand %p1584_p3, %p1580_p0 }
  0x64   : > { %1588 = shalt.err (!%p1585_p5)  }
  0x65   : > { %227 = dma.hbm_to_vmem [thread:$0]  %s223_s7, 16, %s225_s15, [#allocation3] }
  0x66   : > { %s2539_s8 = sld [smem:[#allocation5 + $0x5]]  ;;  %p230_p7 = scmp.gt.s32.totalorder %s1125_s24, 0 }
  0x67   : > { %p1126_p9 = scmp.lt.s32.totalorder %s1125_s24, 1023  ;;  %s2370_s12 = smov [#allocation2 + $0x5]  }
  0x68   : > { %s2541_s5 = sshll.u32 %s2370_s12, 4  ;;  %s1137_s21 = sld [smem:[#allocation5 + $0x6]]  ;;  %s267_s5 = int_to_ptr.vmem [resolvable:$true] %s2541_s5 }
  0x69   : > { %s3176_s24 = smov (!%p230_p7, %s1125_s24), 0  ;;  %s2371_s6 = smov [#allocation2 + $0x6]  }
  0x6a   : > { %s3178_s24 = smov (!%p1126_p9, %s3176_s24), 1023  ;;  %s2549_s23 = sshll.u32 %s2371_s6, 4  ;;  %s288_s23 = int_to_ptr.vmem [resolvable:$true] %s2549_s23 }
  0x6b   : > { %s234_s15 = scalar_lea.hbm %s3127_s1, %s3178_s24 }
  0x6c   : > { %p251_p6 = scmp.gt.s32.totalorder %s2539_s8, 0  ;;  %p1132_p10 = scmp.lt.s32.totalorder %s2539_s8, 1023 }
  0x6d   : > { %s243_s9 = sshll.u32 %s234_s15, 4  ;;  %s244_s9 = int_to_ptr.hbm [resolvable:$true] %s243_s9 }
  0x6e   : > { %p272_p11 = scmp.gt.s32.totalorder %s1137_s21, 0  ;;  %p1138_p12 = scmp.lt.s32.totalorder %s1137_s21, 1023 }
  0x6f   : > { %s1601_s7 = sshra.s32 %s244_s9, 4  ;;  %s1602_s7 = int_to_ptr.hbm [resolvable:$true] %s1601_s7 }
  0x70   : > { %s1603_s10 = scalar_lea.hbm %s1602_s7, 1  ;;  %p1606_p0 = scmp.lt.s32.totalorder %s1602_s7, %s3127_s1 }
  0x71   : > { %p1604_p13 = scmp.ne.s32.totalorder %s1602_s7, %s1603_s10  ;;  %p1607_p1 = scmp.lt.s32.totalorder %s2493_s2, %s1603_s10 }
  0x73   : > { %p1608_p2 = por %p1607_p1, %p1606_p0 }
  0x75   : > { %p1609_p3 = pnand %p1608_p2, %p1604_p13 }
  0x77   : > { %1612 = shalt.err (!%p1609_p3)  }
  0x78   : > { %248 = dma.hbm_to_vmem [thread:$0]  %s244_s9, 16, %s246_s13, [#allocation3] }
  0x79   : > { %s252_s24 = scalar_select %p251_p6, %s2539_s8, 0 }
  0x7a   : > { %s273_s30 = scalar_select %p272_p11, %s1137_s21, 0 }
  0x7b   : > { %s3180_s24 = smov (!%p1132_p10, %s252_s24), 1023 }
  0x7c   : > { %s3182_s30 = smov (!%p1138_p12, %s273_s30), 1023  ;;  %s255_s14 = scalar_lea.hbm %s3127_s1, %s3180_s24 }
  0x7d   : > { %s264_s22 = sshll.u32 %s255_s14, 4  ;;  %s276_s7 = scalar_lea.hbm %s3127_s1, %s3182_s30  ;;  %s265_s22 = int_to_ptr.hbm [resolvable:$true] %s264_s22 }
  0x7e   : > { %s285_s13 = sshll.u32 %s276_s7, 4  ;;  %s1625_s9 = sshra.s32 %s265_s22, 4  ;;  %s1626_s9 = int_to_ptr.hbm [resolvable:$true] %s1625_s9  ;;  %s286_s13 = int_to_ptr.hbm [resolvable:$true] %s285_s13 }
  0x7f   : > { %s1627_s10 = scalar_lea.hbm %s1626_s9, 1  ;;  %p1630_p7 = scmp.lt.s32.totalorder %s1626_s9, %s3127_s1 }
  0x80   : > { %p1628_p5 = scmp.ne.s32.totalorder %s1626_s9, %s1627_s10  ;;  %p1631_p9 = scmp.lt.s32.totalorder %s2493_s2, %s1627_s10 }
  0x82   : > { %p1632_p6 = por %p1631_p9, %p1630_p7 }
  0x84   : > { %p1633_p10 = pnand %p1632_p6, %p1628_p5 }
  0x86   : > { %1636 = shalt.err (!%p1633_p10)  }
  0x87   : > { %269 = dma.hbm_to_vmem [thread:$0]  %s265_s22, 16, %s267_s5, [#allocation3] }
  0x88   : > { %s1143_s21 = sld [smem:[#allocation5 + $0x7]]  ;;  %s1649_s29 = sshra.s32 %s286_s13, 4  ;;  %s1650_s29 = int_to_ptr.hbm [resolvable:$true] %s1649_s29 }
  0x89   : > { %s1651_s24 = scalar_lea.hbm %s1650_s29, 1  ;;  %p1654_p12 = scmp.lt.s32.totalorder %s1650_s29, %s3127_s1 }
  0x8a   : > { %p1652_p11 = scmp.ne.s32.totalorder %s1650_s29, %s1651_s24  ;;  %p1655_p13 = scmp.lt.s32.totalorder %s2493_s2, %s1651_s24 }
  0x8c   : > { %p1656_p0 = por %p1655_p13, %p1654_p12 }
  0x8e   : > { %p1657_p1 = pnand %p1656_p0, %p1652_p11 }
  0x90   : > { %1660 = shalt.err (!%p1657_p1)  }
  0x91   : > { %290 = dma.hbm_to_vmem [thread:$0]  %s286_s13, 16, %s288_s23, [#allocation3] }
  0x92   : > { %s2581_s12 = sld [smem:[#allocation5 + $0x8]]  ;;  %s2372_s5 = smov [#allocation2 + $0x7]  }
  0x93   : > { %s2583_s14 = sshll.u32 %s2372_s5, 4  ;;  %s2373_s22 = smov [#allocation2 + $0x8]   ;;  %s309_s14 = int_to_ptr.vmem [resolvable:$true] %s2583_s14 }
  0x94   : > { %s2586_s15 = sshll.u32 %s2373_s22, 4  ;;  %s2589_s6 = sld [smem:[#allocation5 + $0x9]]  ;;  %s330_s15 = int_to_ptr.vmem [resolvable:$true] %s2586_s15 }
  0x95   : > { %p293_p2 = scmp.gt.s32.totalorder %s1143_s21, 0  ;;  %p1144_p3 = scmp.lt.s32.totalorder %s1143_s21, 1023 }
  0x96   : > { %s2591_s23 = sld [smem:[#allocation5 + $0xa]]  ;;  %s2374_s26 = smov [#allocation2 + $0x9]  }
  0x97   : > { %s3184_s21 = smov (!%p293_p2, %s1143_s21), 0  ;;  %s2601_s29 = sshll.u32 %s2374_s26, 4  ;;  %s351_s29 = int_to_ptr.vmem [resolvable:$true] %s2601_s29 }
  0x98   : > { %p314_p5 = scmp.gt.s32.totalorder %s2581_s12, 0  ;;  %p1150_p7 = scmp.lt.s32.totalorder %s2581_s12, 1023 }
  0x99   : > { %s3186_s21 = smov (!%p1144_p3, %s3184_s21), 1023 }
  0x9a   : > { %s315_s7 = scalar_select %p314_p5, %s2581_s12, 0 }
  0x9b   : > { %s297_s10 = scalar_lea.hbm %s3127_s1, %s3186_s21  ;;  %p335_p9 = scmp.gt.s32.totalorder %s2589_s6, 0 }
  0x9c   : > { %s306_s8 = sshll.u32 %s297_s10, 4  ;;  %p1156_p6 = scmp.lt.s32.totalorder %s2589_s6, 1023  ;;  %s307_s8 = int_to_ptr.hbm [resolvable:$true] %s306_s8 }
  0x9d   : > { %s1673_s24 = sshra.s32 %s307_s8, 4  ;;  %s1674_s24 = int_to_ptr.hbm [resolvable:$true] %s1673_s24 }
  0x9e   : > { %s1675_s30 = scalar_lea.hbm %s1674_s24, 1  ;;  %p1678_p11 = scmp.lt.s32.totalorder %s1674_s24, %s3127_s1 }
  0x9f   : > { %p1676_p10 = scmp.ne.s32.totalorder %s1674_s24, %s1675_s30  ;;  %p1679_p12 = scmp.lt.s32.totalorder %s2493_s2, %s1675_s30 }
  0xa1   : > { %p1680_p13 = por %p1679_p12, %p1678_p11 }
  0xa3   : > { %p1681_p0 = pnand %p1680_p13, %p1676_p10 }
  0xa5   : > { %1684 = shalt.err (!%p1681_p0)  }
  0xa6   : > { %311 = dma.hbm_to_vmem [thread:$0]  %s307_s8, 16, %s309_s14, [#allocation3] }
  0xa7   : > { %s3188_s7 = smov (!%p1150_p7, %s315_s7), 1023  ;;  %p356_p1 = scmp.gt.s32.totalorder %s2591_s23, 0 }
  0xa8   : > { %s336_s21 = scalar_select %p335_p9, %s2589_s6, 0 }
  0xa9   : > { %s318_s9 = scalar_lea.hbm %s3127_s1, %s3188_s7  ;;  %p1162_p2 = scmp.lt.s32.totalorder %s2591_s23, 1023 }
  0xaa   : > { %s327_s10 = sshll.u32 %s318_s9, 4  ;;  %s328_s10 = int_to_ptr.hbm [resolvable:$true] %s327_s10 }
  0xab   : > { %s1697_s26 = sshra.s32 %s328_s10, 4  ;;  %s1698_s26 = int_to_ptr.hbm [resolvable:$true] %s1697_s26 }
  0xac   : > { %s1699_s24 = scalar_lea.hbm %s1698_s26, 1  ;;  %p1702_p5 = scmp.lt.s32.totalorder %s1698_s26, %s3127_s1 }
  0xad   : > { %p1700_p3 = scmp.ne.s32.totalorder %s1698_s26, %s1699_s24  ;;  %p1703_p7 = scmp.lt.s32.totalorder %s2493_s2, %s1699_s24 }
  0xaf   : > { %p1704_p10 = por %p1703_p7, %p1702_p5 }
  0xb1   : > { %p1705_p9 = pnand %p1704_p10, %p1700_p3 }
  0xb3   : > { %1708 = shalt.err (!%p1705_p9)  }
  0xb4   : > { %332 = dma.hbm_to_vmem [thread:$0]  %s328_s10, 16, %s330_s15, [#allocation3] }
  0xb5   : > { %s3190_s21 = smov (!%p1156_p6, %s336_s21), 1023  ;;  %s2375_s22 = smov [#allocation2 + $0xa]  }
  0xb6   : > { %s357_s12 = scalar_select %p356_p1, %s2591_s23, 0 }
  0xb7   : > { %s339_s8 = scalar_lea.hbm %s3127_s1, %s3190_s21  ;;  %s2634_s13 = sshll.u32 %s2375_s22, 4  ;;  %s372_s13 = int_to_ptr.vmem [resolvable:$true] %s2634_s13 }
  0xb8   : > { %s348_s5 = sshll.u32 %s339_s8, 4  ;;  %s349_s5 = int_to_ptr.hbm [resolvable:$true] %s348_s5 }
  0xb9   : > { %s1721_s9 = sshra.s32 %s349_s5, 4  ;;  %s1722_s9 = int_to_ptr.hbm [resolvable:$true] %s1721_s9 }
  0xba   : > { %s1723_s26 = scalar_lea.hbm %s1722_s9, 1  ;;  %p1726_p12 = scmp.lt.s32.totalorder %s1722_s9, %s3127_s1 }
  0xbb   : > { %p1724_p11 = scmp.ne.s32.totalorder %s1722_s9, %s1723_s26  ;;  %p1727_p6 = scmp.lt.s32.totalorder %s2493_s2, %s1723_s26 }
  0xbd   : > { %p1728_p13 = por %p1727_p6, %p1726_p12 }
  0xbf   : > { %p1729_p0 = pnand %p1728_p13, %p1724_p11 }
  0xc1   : > { %1732 = shalt.err (!%p1729_p0)  }
  0xc2   : > { %353 = dma.hbm_to_vmem [thread:$0]  %s349_s5, 16, %s351_s29, [#allocation3] }
  0xc3   : > { %s3192_s12 = smov (!%p1162_p2, %s357_s12), 1023  ;;  %s1167_s15 = sld [smem:[#allocation5 + $0xb]] }
  0xc4   : > { %s360_s10 = scalar_lea.hbm %s3127_s1, %s3192_s12  ;;  %s2376_s14 = smov [#allocation2 + $0xb]  }
  0xc5   : > { %s369_s4 = sshll.u32 %s360_s10, 4  ;;  %s2648_s7 = sshll.u32 %s2376_s14, 4  ;;  %s370_s4 = int_to_ptr.hbm [resolvable:$true] %s369_s4  ;;  %s393_s7 = int_to_ptr.vmem [resolvable:$true] %s2648_s7 }
  0xc6   : > { %s2650_s8 = sld [smem:[#allocation5 + $0xc]]  ;;  %s1745_s22 = sshra.s32 %s370_s4, 4  ;;  %s1746_s22 = int_to_ptr.hbm [resolvable:$true] %s1745_s22 }
  0xc7   : > { %s1747_s9 = scalar_lea.hbm %s1746_s22, 1  ;;  %p1750_p2 = scmp.lt.s32.totalorder %s1746_s22, %s3127_s1 }
  0xc8   : > { %p1748_p1 = scmp.ne.s32.totalorder %s1746_s22, %s1747_s9  ;;  %p1751_p3 = scmp.lt.s32.totalorder %s2493_s2, %s1747_s9 }
  0xca   : > { %p1752_p5 = por %p1751_p3, %p1750_p2 }
  0xcc   : > { %p1753_p7 = pnand %p1752_p5, %p1748_p1 }
  0xce   : > { %1756 = shalt.err (!%p1753_p7)  }
  0xcf   : > { %374 = dma.hbm_to_vmem [thread:$0]  %s370_s4, 16, %s372_s13, [#allocation3] }
  0xd0   : > { %s2656_s12 = sld [smem:[#allocation5 + $0xd]]  ;;  %p377_p10 = scmp.gt.s32.totalorder %s1167_s15, 0 }
  0xd1   : > { %p1168_p9 = scmp.lt.s32.totalorder %s1167_s15, 1023  ;;  %s2377_s5 = smov [#allocation2 + $0xc]  }
  0xd2   : > { %s2659_s26 = sshll.u32 %s2377_s5, 4  ;;  %s3194_s15 = smov (!%p377_p10, %s1167_s15), 0  ;;  %s414_s26 = int_to_ptr.vmem [resolvable:$true] %s2659_s26 }
  0xd3   : > { %p398_p11 = scmp.gt.s32.totalorder %s2650_s8, 0  ;;  %s3196_s15 = smov (!%p1168_p9, %s3194_s15), 1023 }
  0xd4   : > { %s381_s6 = scalar_lea.hbm %s3127_s1, %s3196_s15  ;;  %p1174_p12 = scmp.lt.s32.totalorder %s2650_s8, 1023 }
  0xd5   : > { %s399_s24 = scalar_select %p398_p11, %s2650_s8, 0 }
  0xd6   : > { %s390_s21 = sshll.u32 %s381_s6, 4  ;;  %p419_p6 = scmp.gt.s32.totalorder %s2656_s12, 0  ;;  %s391_s21 = int_to_ptr.hbm [resolvable:$true] %s390_s21 }
  0xd7   : > { %s1769_s10 = sshra.s32 %s391_s21, 4  ;;  %s1770_s10 = int_to_ptr.hbm [resolvable:$true] %s1769_s10 }
  0xd8   : > { %s1771_s4 = scalar_lea.hbm %s1770_s10, 1  ;;  %p1774_p0 = scmp.lt.s32.totalorder %s1770_s10, %s3127_s1 }
  0xd9   : > { %p1772_p13 = scmp.ne.s32.totalorder %s1770_s10, %s1771_s4  ;;  %p1775_p1 = scmp.lt.s32.totalorder %s2493_s2, %s1771_s4 }
  0xdb   : > { %p1776_p2 = por %p1775_p1, %p1774_p0 }
  0xdd   : > { %p1777_p3 = pnand %p1776_p2, %p1772_p13 }
  0xdf   : > { %1780 = shalt.err (!%p1777_p3)  }
  0xe0   : > { %395 = dma.hbm_to_vmem [thread:$0]  %s391_s21, 16, %s393_s7, [#allocation3] }
  0xe1   : > { %s3198_s24 = smov (!%p1174_p12, %s399_s24), 1023  ;;  %p1180_p5 = scmp.lt.s32.totalorder %s2656_s12, 1023 }
  0xe2   : > { %s420_s15 = scalar_select %p419_p6, %s2656_s12, 0 }
  0xe3   : > { %s402_s23 = scalar_lea.hbm %s3127_s1, %s3198_s24  ;;  %s2378_s13 = smov [#allocation2 + $0xd]  }
  0xe4   : > { %s411_s5 = sshll.u32 %s402_s23, 4  ;;  %s2682_s30 = sshll.u32 %s2378_s13, 4  ;;  %s412_s5 = int_to_ptr.hbm [resolvable:$true] %s411_s5  ;;  %s435_s30 = int_to_ptr.vmem [resolvable:$true] %s2682_s30 }
  0xe5   : > { %s2684_s7 = sld [smem:[#allocation5 + $0xe]]  ;;  %s1793_s8 = sshra.s32 %s412_s5, 4  ;;  %s1794_s8 = int_to_ptr.hbm [resolvable:$true] %s1793_s8 }
  0xe6   : > { %s1795_s6 = scalar_lea.hbm %s1794_s8, 1  ;;  %p1798_p10 = scmp.lt.s32.totalorder %s1794_s8, %s3127_s1 }
  0xe7   : > { %p1796_p7 = scmp.ne.s32.totalorder %s1794_s8, %s1795_s6  ;;  %p1799_p9 = scmp.lt.s32.totalorder %s2493_s2, %s1795_s6 }
  0xe9   : > { %p1800_p11 = por %p1799_p9, %p1798_p10 }
  0xeb   : > { %p1801_p12 = pnand %p1800_p11, %p1796_p7 }
  0xed   : > { %1804 = shalt.err (!%p1801_p12)  }
  0xee   : > { %416 = dma.hbm_to_vmem [thread:$0]  %s412_s5, 16, %s414_s26, [#allocation3] }
  0xef   : > { %s3200_s15 = smov (!%p1180_p5, %s420_s15), 1023  ;;  %s2694_s24 = sld [smem:[#allocation5 + $0xf]] }
  0xf0   : > { %s423_s22 = scalar_lea.hbm %s3127_s1, %s3200_s15  ;;  %s2379_s29 = smov [#allocation2 + $0xe]  }
  0xf1   : > { %s432_s9 = sshll.u32 %s423_s22, 4  ;;  %s2700_s23 = sshll.u32 %s2379_s29, 4  ;;  %s433_s9 = int_to_ptr.hbm [resolvable:$true] %s432_s9  ;;  %s456_s23 = int_to_ptr.vmem [resolvable:$true] %s2700_s23 }
  0xf2   : > { %p440_p6 = scmp.gt.s32.totalorder %s2684_s7, 0  ;;  %s1817_s13 = sshra.s32 %s433_s9, 4  ;;  %s1818_s13 = int_to_ptr.hbm [resolvable:$true] %s1817_s13 }
  0xf3   : > { %s1819_s8 = scalar_lea.hbm %s1818_s13, 1  ;;  %p1822_p0 = scmp.lt.s32.totalorder %s1818_s13, %s3127_s1 }
  0xf4   : > { %p1820_p13 = scmp.ne.s32.totalorder %s1818_s13, %s1819_s8  ;;  %p1823_p1 = scmp.lt.s32.totalorder %s2493_s2, %s1819_s8 }
  0xf6   : > { %p1824_p2 = por %p1823_p1, %p1822_p0 }
  0xf8   : > { %p1825_p3 = pnand %p1824_p2, %p1820_p13 }
  0xfa   : > { %1828 = shalt.err (!%p1825_p3)  }
  0xfb   : > { %437 = dma.hbm_to_vmem [thread:$0]  %s433_s9, 16, %s435_s30, [#allocation3] }
  0xfc   : > { %s441_s15 = scalar_select %p440_p6, %s2684_s7, 0 }
  0xfd   : > { %p1186_p5 = scmp.lt.s32.totalorder %s2684_s7, 1023  ;;  %p461_p7 = scmp.gt.s32.totalorder %s2694_s24, 0 }
  0xfe   : > { %p1192_p10 = scmp.lt.s32.totalorder %s2694_s24, 1023  ;;  %s2380_s30 = smov [#allocation2 + $0xf]  }
  0xff   : > { %s3202_s15 = smov (!%p1186_p5, %s441_s15), 1023  ;;  %s476_s14 = sshll.u32 %s2380_s30, 4  ;;  %s477_s14 = int_to_ptr.vmem [resolvable:$true] %s476_s14 }
 0x100   : > { %s462_s5 = scalar_select %p461_p7, %s2694_s24, 0 }
 0x101   : > { %s444_s10 = scalar_lea.hbm %s3127_s1, %s3202_s15 }
 0x102   : > { %s453_s4 = sshll.u32 %s444_s10, 4  ;;  %s454_s4 = int_to_ptr.hbm [resolvable:$true] %s453_s4 }
 0x103   : > { %s1841_s22 = sshra.s32 %s454_s4, 4  ;;  %s1842_s22 = int_to_ptr.hbm [resolvable:$true] %s1841_s22 }
 0x104   : > { %s1843_s9 = scalar_lea.hbm %s1842_s22, 1  ;;  %p1846_p11 = scmp.lt.s32.totalorder %s1842_s22, %s3127_s1 }
 0x105   : > { %p1844_p9 = scmp.ne.s32.totalorder %s1842_s22, %s1843_s9  ;;  %p1847_p12 = scmp.lt.s32.totalorder %s2493_s2, %s1843_s9 }
 0x107   : > { %p1848_p6 = por %p1847_p12, %p1846_p11 }
 0x109   : > { %p1849_p13 = pnand %p1848_p6, %p1844_p9 }
 0x10b   : > { %1852 = shalt.err (!%p1849_p13)  }
 0x10c   : > { %458 = dma.hbm_to_vmem [thread:$0]  %s454_s4, 16, %s456_s23, [#allocation3] }
 0x10d   : > { %s3204_s5 = smov (!%p1192_p10, %s462_s5), 1023 }
 0x10e   : > { %s465_s26 = scalar_lea.hbm %s3127_s1, %s3204_s5 }
 0x10f   : > { %s474_s12 = sshll.u32 %s465_s26, 4  ;;  %s475_s12 = int_to_ptr.hbm [resolvable:$true] %s474_s12 }
 0x110   : > { %s1865_s15 = sshra.s32 %s475_s12, 4  ;;  %s1866_s15 = int_to_ptr.hbm [resolvable:$true] %s1865_s15 }
 0x111   : > { %s1867_s6 = scalar_lea.hbm %s1866_s15, 1  ;;  %p1870_p1 = scmp.lt.s32.totalorder %s1866_s15, %s3127_s1 }
 0x112   : > { %p1868_p0 = scmp.ne.s32.totalorder %s1866_s15, %s1867_s6  ;;  %p1871_p2 = scmp.lt.s32.totalorder %s2493_s2, %s1867_s6 }
 0x114   : > { %p1872_p3 = por %p1871_p2, %p1870_p1 }
 0x116   : > { %p1873_p5 = pnand %p1872_p3, %p1868_p0 }
 0x118   : > { %1876 = shalt.err (!%p1873_p5)  }
 0x119   : > { %479 = dma.hbm_to_vmem [thread:$0]  %s475_s12, 16, %s477_s14, [#allocation3] }
 0x11a PF: > { %s480_s24 = sadd.s32 1, %s2351_s19 }
 0x11b   : > { %p1197_p7 = scmp.ge.s32.totalorder %s480_s24, 2 }
 0x11d   : > { %484 = sbr.rel (%p1197_p7) target bundleno = 695 (0x2b7), region = 100 }
 0x122   : > { %p487_p10 = scmp.lt.s32.totalorder %s480_s24, 0  ;;  %s488_s23 = ssub.s32 0, %s480_s24 }
 0x123   : > { %s1198_s5 = smin.u32 %s488_s23, %s480_s24  ;;  %s1341_s4 = sshll.u32 %s2351_s19, 4 }
 0x124   : > { %s490_s30 = sand.u32 1, %s1198_s5   ;;  %s2731_s22 = sadd.s32 16, %s1341_s4 }
 0x125   : > { %s491_s2 = ssub.s32 0, %s490_s30  ;;  %s500_s9 = sld [smem:[#allocation5 + %s2731_s22]] }
 0x126   : > { %s3206_s2 = smov (!%p487_p10, %s491_s2), %s490_s30  ;;  %s522_s14 = sadd.s32 1, %s2731_s22 }
 0x127   : > { %p1200_p9 = scmp.lt.s32.totalorder %s3206_s2, 0  ;;  %s497_s29 = sadd.s32 2, %s3206_s2 }
 0x128   : > { %s2735_s7 = sld [smem:[#allocation5 + %s522_s14]]  ;;  %s544_s13 = sadd.s32 2, %s2731_s22 }
 0x129   : > { %s3208_s29 = smov (!%p1200_p9, %s497_s29), %s3206_s2  ;;  %s2738_s26 = sld [smem:[#allocation5 + %s544_s13]] }
 0x12a   : > { %s1207_s8 = sshll.u32 %s3208_s29, 4  ;;  %s2749_s5 = scalar_lea.sflag [#allocation3], %s3208_s29 }
 0x12b   : > { %p501_p11 = scmp.gt.s32.totalorder %s500_s9, 0  ;;  %p1202_p12 = scmp.lt.s32.totalorder %s500_s9, 1023 }
 0x12c   : > { %s2740_s12 = scalar_lea.vmem [#allocation2], %s1207_s8  ;;  %s2754_s13 = scalar_lea.hbm %s3127_s1, 1024 }
 0x12d   : > { %s3210_s9 = smov (!%p501_p11, %s500_s9), 0  ;;  %s518_s15 = sshll.u32 %s2740_s12, 4  ;;  %s519_s15 = int_to_ptr.vmem [resolvable:$true] %s518_s15 }
 0x12e   : > { %s3212_s9 = smov (!%p1202_p12, %s3210_s9), 1023  ;;  %p524_p6 = scmp.gt.s32.totalorder %s2735_s7, 0 }
 0x12f   : > { %s505_s10 = scalar_lea.hbm %s3127_s1, %s3212_s9  ;;  %p1208_p13 = scmp.lt.s32.totalorder %s2735_s7, 1023 }
 0x130   : > { %s516_s24 = sshll.u32 %s505_s10, 4  ;;  %s992_s23 = scalar_lea.vmem %s2740_s12, 1 [#allocation2]  ;;  %s517_s24 = int_to_ptr.hbm [resolvable:$true] %s516_s24 }
 0x131   : > { %s1889_s4 = sshra.s32 %s517_s24, 4  ;;  %s1890_s4 = int_to_ptr.hbm [resolvable:$true] %s1889_s4 }
 0x132   : > { %s1891_s30 = scalar_lea.hbm %s1890_s4, 1  ;;  %p1894_p1 = scmp.lt.s32.totalorder %s1890_s4, %s3127_s1 }
 0x133   : > { %p1892_p0 = scmp.ne.s32.totalorder %s1890_s4, %s1891_s30  ;;  %p1895_p2 = scmp.lt.s32.totalorder %s2754_s13, %s1891_s30 }
 0x135   : > { %p1896_p3 = por %p1895_p2, %p1894_p1 }
 0x137   : > { %p1897_p5 = pnand %p1896_p3, %p1892_p0 }
 0x139   : > { %1900 = shalt.err (!%p1897_p5)  }
 0x13a   : > { %s1901_s9 = sshra.s32 %s519_s15, 4  ;;  %s2381_s6 = smov [#allocation2]   ;;  %s1902_s9 = int_to_ptr.vmem [resolvable:$true] %s1901_s9 }
 0x13b   : > { %s1903_s29 = scalar_lea.vmem %s1902_s9, 1  ;;  %s2760_s21 = scalar_lea.vmem %s2381_s6, 32 }
 0x13c   : > { %p1904_p7 = scmp.ne.s32.totalorder %s1902_s9, %s1903_s29  ;;  %p1906_p10 = scmp.lt.s32.totalorder %s1902_s9, [#allocation2] }
 0x13d   : > { %p1907_p9 = scmp.lt.s32.totalorder %s2760_s21, %s1903_s29 }
 0x13f   : > { %p1908_p11 = por %p1907_p9, %p1906_p10 }
 0x141   : > { %p1909_p12 = pnand %p1908_p11, %p1904_p7 }
 0x143   : > { %1912 = shalt.err (!%p1909_p12)  }
 0x144   : > { %521 = dma.hbm_to_vmem [thread:$0]  %s517_s24, 16, %s519_s15, %s2749_s5 }
 0x145   : > { %s525_s20 = scalar_select %p524_p6, %s2735_s7, 0 }
 0x146   : > { %s2767_s10 = sshll.u32 %s992_s23, 4  ;;  %p546_p0 = scmp.gt.s32.totalorder %s2738_s26, 0  ;;  %s541_s10 = int_to_ptr.vmem [resolvable:$true] %s2767_s10 }
 0x147   : > { %s3214_s20 = smov (!%p1208_p13, %s525_s20), 1023  ;;  %s566_s4 = sadd.s32 3, %s2731_s22 }
 0x148   : > { %s528_s14 = scalar_lea.hbm %s3127_s1, %s3214_s20  ;;  %p1214_p1 = scmp.lt.s32.totalorder %s2738_s26, 1023 }
 0x149   : > { %s538_s8 = sshll.u32 %s528_s14, 4  ;;  %s996_s9 = scalar_lea.vmem %s2740_s12, 2 [#allocation2]  ;;  %s539_s8 = int_to_ptr.hbm [resolvable:$true] %s538_s8 }
 0x14a   : > { %s1913_s15 = sshra.s32 %s539_s8, 4  ;;  %s1914_s15 = int_to_ptr.hbm [resolvable:$true] %s1913_s15 }
 0x14b   : > { %s1915_s24 = scalar_lea.hbm %s1914_s15, 1  ;;  %p1918_p2 = scmp.lt.s32.totalorder %s1914_s15, %s3127_s1 }
 0x14c   : > { %p1916_p6 = scmp.ne.s32.totalorder %s1914_s15, %s1915_s24  ;;  %p1919_p13 = scmp.lt.s32.totalorder %s2754_s13, %s1915_s24 }
 0x14e   : > { %p1920_p3 = por %p1919_p13, %p1918_p2 }
 0x150   : > { %p1921_p5 = pnand %p1920_p3, %p1916_p6 }
 0x152   : > { %1924 = shalt.err (!%p1921_p5)  }
 0x153   : > { %s1925_s7 = sshra.s32 %s541_s10, 4  ;;  %s1926_s7 = int_to_ptr.vmem [resolvable:$true] %s1925_s7 }
 0x154   : > { %s1927_s6 = scalar_lea.vmem %s1926_s7, 1  ;;  %p1930_p10 = scmp.lt.s32.totalorder %s1926_s7, [#allocation2] }
 0x155   : > { %p1928_p7 = scmp.ne.s32.totalorder %s1926_s7, %s1927_s6  ;;  %p1931_p9 = scmp.lt.s32.totalorder %s2760_s21, %s1927_s6 }
 0x157   : > { %p1932_p11 = por %p1931_p9, %p1930_p10 }
 0x159   : > { %p1933_p12 = pnand %p1932_p11, %p1928_p7 }
 0x15b   : > { %1936 = shalt.err (!%p1933_p12)  }
 0x15c   : > { %543 = dma.hbm_to_vmem [thread:$0]  %s539_s8, 16, %s541_s10, %s2749_s5 }
 0x15d   : > { %s547_s20 = scalar_select %p546_p0, %s2738_s26, 0 }
 0x15e   : > { %s2788_s30 = sshll.u32 %s996_s9, 4  ;;  %s2790_s2 = sld [smem:[#allocation5 + %s566_s4]]  ;;  %s563_s30 = int_to_ptr.vmem [resolvable:$true] %s2788_s30 }
 0x15f   : > { %s3216_s20 = smov (!%p1214_p1, %s547_s20), 1023  ;;  %s1000_s14 = scalar_lea.vmem %s2740_s12, 3 [#allocation2] }
 0x160   : > { %s588_s15 = sadd.s32 4, %s2731_s22  ;;  %s550_s29 = scalar_lea.hbm %s3127_s1, %s3216_s20 }
 0x161   : > { %s560_s7 = sshll.u32 %s550_s29, 4  ;;  %s2800_s6 = sld [smem:[#allocation5 + %s588_s15]]  ;;  %s561_s7 = int_to_ptr.hbm [resolvable:$true] %s560_s7 }
 0x162   : > { %s2802_s10 = sshll.u32 %s1000_s14, 4  ;;  %s1937_s8 = sshra.s32 %s561_s7, 4  ;;  %s1938_s8 = int_to_ptr.hbm [resolvable:$true] %s1937_s8 }
 0x163   : > { %3150 = sst [smem:[#allocation85_spill]] %s2802_s10  ;;  %s1939_s9 = scalar_lea.hbm %s1938_s8, 1 }
 0x164   : > { %p1940_p0 = scmp.ne.s32.totalorder %s1938_s8, %s1939_s9  ;;  %p1942_p1 = scmp.lt.s32.totalorder %s1938_s8, %s3127_s1 }
 0x165   : > { %p1943_p6 = scmp.lt.s32.totalorder %s2754_s13, %s1939_s9 }
 0x167   : > { %p1944_p2 = por %p1943_p6, %p1942_p1 }
 0x169   : > { %p1945_p13 = pnand %p1944_p2, %p1940_p0 }
 0x16b   : > { %1948 = shalt.err (!%p1945_p13)  }
 0x16c   : > { %s1949_s20 = sshra.s32 %s563_s30, 4  ;;  %s1950_s20 = int_to_ptr.vmem [resolvable:$true] %s1949_s20 }
 0x16d   : > { %s1951_s15 = scalar_lea.vmem %s1950_s20, 1  ;;  %p1954_p5 = scmp.lt.s32.totalorder %s1950_s20, [#allocation2] }
 0x16e   : > { %p1952_p3 = scmp.ne.s32.totalorder %s1950_s20, %s1951_s15  ;;  %p1955_p7 = scmp.lt.s32.totalorder %s2760_s21, %s1951_s15 }
 0x170   : > { %p1956_p10 = por %p1955_p7, %p1954_p5 }
 0x172   : > { %p1957_p9 = pnand %p1956_p10, %p1952_p3 }
 0x174   : > { %1960 = shalt.err (!%p1957_p9)  }
 0x175   : > { %565 = dma.hbm_to_vmem [thread:$0]  %s561_s7, 16, %s563_s30, %s2749_s5 }
 0x176   : > { %p568_p11 = scmp.gt.s32.totalorder %s2790_s2, 0  ;;  %p1220_p12 = scmp.lt.s32.totalorder %s2790_s2, 1023 }
 0x177   : > { %s1004_s14 = scalar_lea.vmem %s2740_s12, 4 [#allocation2]  ;;  %p590_p0 = scmp.gt.s32.totalorder %s2800_s6, 0 }
 0x178   : > { %s3218_s2 = smov (!%p568_p11, %s2790_s2), 0  ;;  %s610_s24 = sadd.s32 5, %s2731_s22 }
 0x179   : > { %s3220_s2 = smov (!%p1220_p12, %s3218_s2), 1023  ;;  %p1226_p1 = scmp.lt.s32.totalorder %s2800_s6, 1023 }
 0x17a   : > { %s591_s23 = scalar_select %p590_p0, %s2800_s6, 0 }
 0x17b   : > { %s572_s9 = scalar_lea.hbm %s3127_s1, %s3220_s2  ;;  %s2822_s26 = sld [smem:[#allocation5 + %s610_s24]] }
 0x17c   : > { %s582_s4 = sshll.u32 %s572_s9, 4  ;;  %s2824_s30 = sshll.u32 %s1004_s14, 4  ;;  %s583_s4 = int_to_ptr.hbm [resolvable:$true] %s582_s4  ;;  %s607_s30 = int_to_ptr.vmem [resolvable:$true] %s2824_s30 }
 0x17d   : > { %s1961_s7 = sshra.s32 %s583_s4, 4  ;;  %s1962_s7 = int_to_ptr.hbm [resolvable:$true] %s1961_s7 }
 0x17e   : > { %s1963_s20 = scalar_lea.hbm %s1962_s7, 1  ;;  %p1966_p2 = scmp.lt.s32.totalorder %s1962_s7, %s3127_s1 }
 0x17f   : > { %p1964_p6 = scmp.ne.s32.totalorder %s1962_s7, %s1963_s20  ;;  %p1967_p13 = scmp.lt.s32.totalorder %s2754_s13, %s1963_s20 }
 0x181   : > { %p1968_p3 = por %p1967_p13, %p1966_p2 }
 0x183   : > { %p1969_p5 = pnand %p1968_p3, %p1964_p6 }
 0x185   : > { %1972 = shalt.err (!%p1969_p5)  }
 0x186   : > { %s3151_s2 = sld [smem:[#allocation85_spill]] }
 0x18c   : > { %s3152_s29 = int_to_ptr.vmem [resolvable:$true] %s3151_s2 }
 0x18d   : > { %s1973_s24 = sshra.s32 %s3152_s29, 4  ;;  %s1974_s24 = int_to_ptr.vmem [resolvable:$true] %s1973_s24 }
 0x18e   : > { %s1975_s8 = scalar_lea.vmem %s1974_s24, 1  ;;  %p1978_p10 = scmp.lt.s32.totalorder %s1974_s24, [#allocation2] }
 0x18f   : > { %p1976_p7 = scmp.ne.s32.totalorder %s1974_s24, %s1975_s8  ;;  %p1979_p9 = scmp.lt.s32.totalorder %s2760_s21, %s1975_s8 }
 0x191   : > { %p1980_p11 = por %p1979_p9, %p1978_p10 }
 0x193   : > { %p1981_p12 = pnand %p1980_p11, %p1976_p7 }
 0x195   : > { %1984 = shalt.err (!%p1981_p12)  }
 0x196   : > { %s3153_s10 = smov %s3152_s29  ;;  %s3222_s23 = smov (!%p1226_p1, %s591_s23), 1023 }
 0x197   : > { %587 = dma.hbm_to_vmem [thread:$0]  %s583_s4, 16, %s3153_s10, %s2749_s5 }
 0x198   : > { %s1008_s14 = scalar_lea.vmem %s2740_s12, 5 [#allocation2]  ;;  %s594_s20 = scalar_lea.hbm %s3127_s1, %s3222_s23 }
 0x199   : > { %s632_s15 = sadd.s32 6, %s2731_s22  ;;  %s604_s29 = sshll.u32 %s594_s20, 4  ;;  %s605_s29 = int_to_ptr.hbm [resolvable:$true] %s604_s29 }
 0x19a   : > { %p612_p0 = scmp.gt.s32.totalorder %s2822_s26, 0  ;;  %p1232_p6 = scmp.lt.s32.totalorder %s2822_s26, 1023 }
 0x19b   : > { %s1985_s2 = sshra.s32 %s605_s29, 4  ;;  %s1986_s2 = int_to_ptr.hbm [resolvable:$true] %s1985_s2 }
 0x19c   : > { %s1987_s24 = scalar_lea.hbm %s1986_s2, 1  ;;  %p1990_p13 = scmp.lt.s32.totalorder %s1986_s2, %s3127_s1 }
 0x19d   : > { %p1988_p2 = scmp.ne.s32.totalorder %s1986_s2, %s1987_s24  ;;  %p1991_p1 = scmp.lt.s32.totalorder %s2754_s13, %s1987_s24 }
 0x19f   : > { %p1992_p3 = por %p1991_p1, %p1990_p13 }
 0x1a1   : > { %p1993_p5 = pnand %p1992_p3, %p1988_p2 }
 0x1a3   : > { %1996 = shalt.err (!%p1993_p5)  }
 0x1a4   : > { %s1997_s6 = sshra.s32 %s607_s30, 4  ;;  %s1998_s6 = int_to_ptr.vmem [resolvable:$true] %s1997_s6 }
 0x1a5   : > { %s1999_s23 = scalar_lea.vmem %s1998_s6, 1  ;;  %p2002_p10 = scmp.lt.s32.totalorder %s1998_s6, [#allocation2] }
 0x1a6   : > { %p2000_p7 = scmp.ne.s32.totalorder %s1998_s6, %s1999_s23  ;;  %p2003_p9 = scmp.lt.s32.totalorder %s2760_s21, %s1999_s23 }
 0x1a8   : > { %p2004_p11 = por %p2003_p9, %p2002_p10 }
 0x1aa   : > { %p2005_p12 = pnand %p2004_p11, %p2000_p7 }
 0x1ac   : > { %2008 = shalt.err (!%p2005_p12)  }
 0x1ad   : > { %609 = dma.hbm_to_vmem [thread:$0]  %s605_s29, 16, %s607_s30, %s2749_s5 }
 0x1ae   : > { %s613_s28 = scalar_select %p612_p0, %s2822_s26, 0 }
 0x1af   : > { %s2855_s4 = sshll.u32 %s1008_s14, 4  ;;  %s2857_s10 = sld [smem:[#allocation5 + %s632_s15]]  ;;  %s629_s4 = int_to_ptr.vmem [resolvable:$true] %s2855_s4 }
 0x1b0   : > { %s3224_s28 = smov (!%p1232_p6, %s613_s28), 1023  ;;  %s1012_s9 = scalar_lea.vmem %s2740_s12, 6 [#allocation2] }
 0x1b1   : > { %s654_s7 = sadd.s32 7, %s2731_s22  ;;  %s616_s24 = scalar_lea.hbm %s3127_s1, %s3224_s28 }
 0x1b2   : > { %s626_s8 = sshll.u32 %s616_s24, 4  ;;  %s2867_s6 = sld [smem:[#allocation5 + %s654_s7]]  ;;  %s627_s8 = int_to_ptr.hbm [resolvable:$true] %s626_s8 }
 0x1b3   : > { %s2869_s30 = sshll.u32 %s1012_s9, 4  ;;  %s2009_s14 = sshra.s32 %s627_s8, 4  ;;  %s2010_s14 = int_to_ptr.hbm [resolvable:$true] %s2009_s14  ;;  %s651_s30 = int_to_ptr.vmem [resolvable:$true] %s2869_s30 }
 0x1b4   : > { %s2011_s29 = scalar_lea.hbm %s2010_s14, 1  ;;  %p2014_p6 = scmp.lt.s32.totalorder %s2010_s14, %s3127_s1 }
 0x1b5   : > { %p2012_p0 = scmp.ne.s32.totalorder %s2010_s14, %s2011_s29  ;;  %p2015_p2 = scmp.lt.s32.totalorder %s2754_s13, %s2011_s29 }
 0x1b7   : > { %p2016_p13 = por %p2015_p2, %p2014_p6 }
 0x1b9   : > { %p2017_p1 = pnand %p2016_p13, %p2012_p0 }
 0x1bb   : > { %2020 = shalt.err (!%p2017_p1)  }
 0x1bc   : > { %s2021_s23 = sshra.s32 %s629_s4, 4  ;;  %s2022_s23 = int_to_ptr.vmem [resolvable:$true] %s2021_s23 }
 0x1bd   : > { %s2023_s28 = scalar_lea.vmem %s2022_s23, 1  ;;  %p2026_p5 = scmp.lt.s32.totalorder %s2022_s23, [#allocation2] }
 0x1be   : > { %p2024_p3 = scmp.ne.s32.totalorder %s2022_s23, %s2023_s28  ;;  %p2027_p7 = scmp.lt.s32.totalorder %s2760_s21, %s2023_s28 }
 0x1c0   : > { %p2028_p10 = por %p2027_p7, %p2026_p5 }
 0x1c2   : > { %p2029_p9 = pnand %p2028_p10, %p2024_p3 }
 0x1c4   : > { %2032 = shalt.err (!%p2029_p9)  }
 0x1c5   : > { %631 = dma.hbm_to_vmem [thread:$0]  %s627_s8, 16, %s629_s4, %s2749_s5 }
 0x1c6   : > { %p634_p11 = scmp.gt.s32.totalorder %s2857_s10, 0  ;;  %p1238_p12 = scmp.lt.s32.totalorder %s2857_s10, 1023 }
 0x1c7   : > { %s1016_s9 = scalar_lea.vmem %s2740_s12, 7 [#allocation2]  ;;  %p656_p0 = scmp.gt.s32.totalorder %s2867_s6, 0 }
 0x1c8   : > { %s3226_s10 = smov (!%p634_p11, %s2857_s10), 0  ;;  %s676_s7 = sadd.s32 8, %s2731_s22 }
 0x1c9   : > { %s3228_s10 = smov (!%p1238_p12, %s3226_s10), 1023  ;;  %p1244_p6 = scmp.lt.s32.totalorder %s2867_s6, 1023 }
 0x1ca   : > { %s657_s20 = scalar_select %p656_p0, %s2867_s6, 0 }
 0x1cb   : > { %s638_s14 = scalar_lea.hbm %s3127_s1, %s3228_s10  ;;  %s2889_s15 = sld [smem:[#allocation5 + %s676_s7]] }
 0x1cc   : > { %s648_s29 = sshll.u32 %s638_s14, 4  ;;  %s2891_s4 = sshll.u32 %s1016_s9, 4  ;;  %s649_s29 = int_to_ptr.hbm [resolvable:$true] %s648_s29  ;;  %s673_s4 = int_to_ptr.vmem [resolvable:$true] %s2891_s4 }
 0x1cd   : > { %s2033_s8 = sshra.s32 %s649_s29, 4  ;;  %s2034_s8 = int_to_ptr.hbm [resolvable:$true] %s2033_s8 }
 0x1ce   : > { %s2035_s26 = scalar_lea.hbm %s2034_s8, 1  ;;  %p2038_p13 = scmp.lt.s32.totalorder %s2034_s8, %s3127_s1 }
 0x1cf   : > { %p2036_p2 = scmp.ne.s32.totalorder %s2034_s8, %s2035_s26  ;;  %p2039_p1 = scmp.lt.s32.totalorder %s2754_s13, %s2035_s26 }
 0x1d1   : > { %p2040_p3 = por %p2039_p1, %p2038_p13 }
 0x1d3   : > { %p2041_p5 = pnand %p2040_p3, %p2036_p2 }
 0x1d5   : > { %2044 = shalt.err (!%p2041_p5)  }
 0x1d6   : > { %s2045_s10 = sshra.s32 %s651_s30, 4  ;;  %s2046_s10 = int_to_ptr.vmem [resolvable:$true] %s2045_s10 }
 0x1d7   : > { %s2047_s7 = scalar_lea.vmem %s2046_s10, 1  ;;  %p2050_p10 = scmp.lt.s32.totalorder %s2046_s10, [#allocation2] }
 0x1d8   : > { %p2048_p7 = scmp.ne.s32.totalorder %s2046_s10, %s2047_s7  ;;  %p2051_p9 = scmp.lt.s32.totalorder %s2760_s21, %s2047_s7 }
 0x1da   : > { %p2052_p11 = por %p2051_p9, %p2050_p10 }
 0x1dc   : > { %p2053_p12 = pnand %p2052_p11, %p2048_p7 }
 0x1de   : > { %2056 = shalt.err (!%p2053_p12)  }
 0x1df   : > { %653 = dma.hbm_to_vmem [thread:$0]  %s649_s29, 16, %s651_s30, %s2749_s5 }
 0x1e0   : > { %s3230_s20 = smov (!%p1244_p6, %s657_s20), 1023  ;;  %s1020_s9 = scalar_lea.vmem %s2740_s12, 8 [#allocation2] }
 0x1e1   : > { %s660_s14 = scalar_lea.hbm %s3127_s1, %s3230_s20  ;;  %s698_s8 = sadd.s32 9, %s2731_s22 }
 0x1e2   : > { %s670_s26 = sshll.u32 %s660_s14, 4  ;;  %p678_p0 = scmp.gt.s32.totalorder %s2889_s15, 0  ;;  %s671_s26 = int_to_ptr.hbm [resolvable:$true] %s670_s26 }
 0x1e3   : > { %p1250_p2 = scmp.lt.s32.totalorder %s2889_s15, 1023  ;;  %s2057_s23 = sshra.s32 %s671_s26, 4  ;;  %s2058_s23 = int_to_ptr.hbm [resolvable:$true] %s2057_s23 }
 0x1e4   : > { %s2059_s28 = scalar_lea.hbm %s2058_s23, 1  ;;  %p2062_p1 = scmp.lt.s32.totalorder %s2058_s23, %s3127_s1 }
 0x1e5   : > { %p2060_p13 = scmp.ne.s32.totalorder %s2058_s23, %s2059_s28  ;;  %p2063_p6 = scmp.lt.s32.totalorder %s2754_s13, %s2059_s28 }
 0x1e7   : > { %p2064_p3 = por %p2063_p6, %p2062_p1 }
 0x1e9   : > { %p2065_p5 = pnand %p2064_p3, %p2060_p13 }
 0x1eb   : > { %2068 = shalt.err (!%p2065_p5)  }
 0x1ec   : > { %s2069_s6 = sshra.s32 %s673_s4, 4  ;;  %s2070_s6 = int_to_ptr.vmem [resolvable:$true] %s2069_s6 }
 0x1ed   : > { %s2071_s30 = scalar_lea.vmem %s2070_s6, 1  ;;  %p2074_p10 = scmp.lt.s32.totalorder %s2070_s6, [#allocation2] }
 0x1ee   : > { %p2072_p7 = scmp.ne.s32.totalorder %s2070_s6, %s2071_s30  ;;  %p2075_p9 = scmp.lt.s32.totalorder %s2760_s21, %s2071_s30 }
 0x1f0   : > { %p2076_p11 = por %p2075_p9, %p2074_p10 }
 0x1f2   : > { %p2077_p12 = pnand %p2076_p11, %p2072_p7 }
 0x1f4   : > { %2080 = shalt.err (!%p2077_p12)  }
 0x1f5   : > { %675 = dma.hbm_to_vmem [thread:$0]  %s671_s26, 16, %s673_s4, %s2749_s5 }
 0x1f6   : > { %s679_s20 = scalar_select %p678_p0, %s2889_s15, 0 }
 0x1f7   : > { %s2922_s29 = sshll.u32 %s1020_s9, 4  ;;  %s2924_s2 = sld [smem:[#allocation5 + %s698_s8]]  ;;  %s695_s29 = int_to_ptr.vmem [resolvable:$true] %s2922_s29 }
 0x1f8   : > { %s3232_s20 = smov (!%p1250_p2, %s679_s20), 1023  ;;  %s1024_s24 = scalar_lea.vmem %s2740_s12, 9 [#allocation2] }
 0x1f9   : > { %s720_s14 = sadd.s32 10, %s2731_s22  ;;  %s682_s10 = scalar_lea.hbm %s3127_s1, %s3232_s20 }
 0x1fa   : > { %s692_s7 = sshll.u32 %s682_s10, 4  ;;  %s2934_s6 = sld [smem:[#allocation5 + %s720_s14]]  ;;  %s693_s7 = int_to_ptr.hbm [resolvable:$true] %s692_s7 }
 0x1fb   : > { %s2936_s4 = sshll.u32 %s1024_s24, 4  ;;  %s2081_s9 = sshra.s32 %s693_s7, 4  ;;  %s2082_s9 = int_to_ptr.hbm [resolvable:$true] %s2081_s9  ;;  %s717_s4 = int_to_ptr.vmem [resolvable:$true] %s2936_s4 }
 0x1fc   : > { %s2083_s26 = scalar_lea.hbm %s2082_s9, 1  ;;  %p2086_p2 = scmp.lt.s32.totalorder %s2082_s9, %s3127_s1 }
 0x1fd   : > { %p2084_p0 = scmp.ne.s32.totalorder %s2082_s9, %s2083_s26  ;;  %p2087_p13 = scmp.lt.s32.totalorder %s2754_s13, %s2083_s26 }
 0x1ff   : > { %p2088_p1 = por %p2087_p13, %p2086_p2 }
 0x201   : > { %p2089_p6 = pnand %p2088_p1, %p2084_p0 }
 0x203   : > { %2092 = shalt.err (!%p2089_p6)  }
 0x204   : > { %s2093_s30 = sshra.s32 %s695_s29, 4  ;;  %s2094_s30 = int_to_ptr.vmem [resolvable:$true] %s2093_s30 }
 0x205   : > { %s2095_s20 = scalar_lea.vmem %s2094_s30, 1  ;;  %p2098_p5 = scmp.lt.s32.totalorder %s2094_s30, [#allocation2] }
 0x206   : > { %p2096_p3 = scmp.ne.s32.totalorder %s2094_s30, %s2095_s20  ;;  %p2099_p7 = scmp.lt.s32.totalorder %s2760_s21, %s2095_s20 }
 0x208   : > { %p2100_p10 = por %p2099_p7, %p2098_p5 }
 0x20a   : > { %p2101_p9 = pnand %p2100_p10, %p2096_p3 }
 0x20c   : > { %2104 = shalt.err (!%p2101_p9)  }
 0x20d   : > { %697 = dma.hbm_to_vmem [thread:$0]  %s693_s7, 16, %s695_s29, %s2749_s5 }
 0x20e   : > { %p700_p11 = scmp.gt.s32.totalorder %s2924_s2, 0  ;;  %p1256_p12 = scmp.lt.s32.totalorder %s2924_s2, 1023 }
 0x20f   : > { %s1028_s24 = scalar_lea.vmem %s2740_s12, 10 [#allocation2]  ;;  %p722_p0 = scmp.gt.s32.totalorder %s2934_s6, 0 }
 0x210   : > { %s3234_s2 = smov (!%p700_p11, %s2924_s2), 0  ;;  %s742_s14 = sadd.s32 11, %s2731_s22 }
 0x211   : > { %s3236_s2 = smov (!%p1256_p12, %s3234_s2), 1023  ;;  %p1262_p2 = scmp.lt.s32.totalorder %s2934_s6, 1023 }
 0x212   : > { %s723_s23 = scalar_select %p722_p0, %s2934_s6, 0 }
 0x213   : > { %s704_s9 = scalar_lea.hbm %s3127_s1, %s3236_s2  ;;  %s2956_s8 = sld [smem:[#allocation5 + %s742_s14]] }
 0x214   : > { %s714_s26 = sshll.u32 %s704_s9, 4  ;;  %s2958_s29 = sshll.u32 %s1028_s24, 4  ;;  %s715_s26 = int_to_ptr.hbm [resolvable:$true] %s714_s26  ;;  %s739_s29 = int_to_ptr.vmem [resolvable:$true] %s2958_s29 }
 0x215   : > { %s2105_s7 = sshra.s32 %s715_s26, 4  ;;  %s2106_s7 = int_to_ptr.hbm [resolvable:$true] %s2105_s7 }
 0x216   : > { %s2107_s15 = scalar_lea.hbm %s2106_s7, 1  ;;  %p2110_p1 = scmp.lt.s32.totalorder %s2106_s7, %s3127_s1 }
 0x217   : > { %p2108_p13 = scmp.ne.s32.totalorder %s2106_s7, %s2107_s15  ;;  %p2111_p6 = scmp.lt.s32.totalorder %s2754_s13, %s2107_s15 }
 0x219   : > { %p2112_p3 = por %p2111_p6, %p2110_p1 }
 0x21b   : > { %p2113_p5 = pnand %p2112_p3, %p2108_p13 }
 0x21d   : > { %2116 = shalt.err (!%p2113_p5)  }
 0x21e   : > { %s2117_s2 = sshra.s32 %s717_s4, 4  ;;  %s2118_s2 = int_to_ptr.vmem [resolvable:$true] %s2117_s2 }
 0x21f   : > { %s2119_s14 = scalar_lea.vmem %s2118_s2, 1  ;;  %p2122_p10 = scmp.lt.s32.totalorder %s2118_s2, [#allocation2] }
 0x220   : > { %p2120_p7 = scmp.ne.s32.totalorder %s2118_s2, %s2119_s14  ;;  %p2123_p9 = scmp.lt.s32.totalorder %s2760_s21, %s2119_s14 }
 0x222   : > { %p2124_p11 = por %p2123_p9, %p2122_p10 }
 0x224   : > { %p2125_p12 = pnand %p2124_p11, %p2120_p7 }
 0x226   : > { %2128 = shalt.err (!%p2125_p12)  }
 0x227   : > { %719 = dma.hbm_to_vmem [thread:$0]  %s715_s26, 16, %s717_s4, %s2749_s5 }
 0x228   : > { %s3238_s23 = smov (!%p1262_p2, %s723_s23), 1023  ;;  %s1032_s24 = scalar_lea.vmem %s2740_s12, 11 [#allocation2] }
 0x229   : > { %s726_s9 = scalar_lea.hbm %s3127_s1, %s3238_s23  ;;  %s764_s7 = sadd.s32 12, %s2731_s22 }
 0x22a   : > { %s736_s15 = sshll.u32 %s726_s9, 4  ;;  %p744_p0 = scmp.gt.s32.totalorder %s2956_s8, 0  ;;  %s737_s15 = int_to_ptr.hbm [resolvable:$true] %s736_s15 }
 0x22b   : > { %p1268_p13 = scmp.lt.s32.totalorder %s2956_s8, 1023  ;;  %s2129_s30 = sshra.s32 %s737_s15, 4  ;;  %s2130_s30 = int_to_ptr.hbm [resolvable:$true] %s2129_s30 }
 0x22c   : > { %s2131_s20 = scalar_lea.hbm %s2130_s30, 1  ;;  %p2134_p6 = scmp.lt.s32.totalorder %s2130_s30, %s3127_s1 }
 0x22d   : > { %p2132_p1 = scmp.ne.s32.totalorder %s2130_s30, %s2131_s20  ;;  %p2135_p2 = scmp.lt.s32.totalorder %s2754_s13, %s2131_s20 }
 0x22f   : > { %p2136_p3 = por %p2135_p2, %p2134_p6 }
 0x231   : > { %p2137_p5 = pnand %p2136_p3, %p2132_p1 }
 0x233   : > { %2140 = shalt.err (!%p2137_p5)  }
 0x234   : > { %s2141_s6 = sshra.s32 %s739_s29, 4  ;;  %s2142_s6 = int_to_ptr.vmem [resolvable:$true] %s2141_s6 }
 0x235   : > { %s2143_s4 = scalar_lea.vmem %s2142_s6, 1  ;;  %p2146_p10 = scmp.lt.s32.totalorder %s2142_s6, [#allocation2] }
 0x236   : > { %p2144_p7 = scmp.ne.s32.totalorder %s2142_s6, %s2143_s4  ;;  %p2147_p9 = scmp.lt.s32.totalorder %s2760_s21, %s2143_s4 }
 0x238   : > { %p2148_p11 = por %p2147_p9, %p2146_p10 }
 0x23a   : > { %p2149_p12 = pnand %p2148_p11, %p2144_p7 }
 0x23c   : > { %2152 = shalt.err (!%p2149_p12)  }
 0x23d   : > { %741 = dma.hbm_to_vmem [thread:$0]  %s737_s15, 16, %s739_s29, %s2749_s5 }
 0x23e   : > { %s745_s23 = scalar_select %p744_p0, %s2956_s8, 0 }
 0x23f   : > { %s2989_s26 = sshll.u32 %s1032_s24, 4  ;;  %s2991_s28 = sld [smem:[#allocation5 + %s764_s7]]  ;;  %s761_s26 = int_to_ptr.vmem [resolvable:$true] %s2989_s26 }
 0x240   : > { %s3240_s23 = smov (!%p1268_p13, %s745_s23), 1023  ;;  %s1036_s10 = scalar_lea.vmem %s2740_s12, 12 [#allocation2] }
 0x241   : > { %s786_s9 = sadd.s32 13, %s2731_s22  ;;  %s748_s2 = scalar_lea.hbm %s3127_s1, %s3240_s23 }
 0x242   : > { %s758_s14 = sshll.u32 %s748_s2, 4  ;;  %s3001_s6 = sld [smem:[#allocation5 + %s786_s9]]  ;;  %s759_s14 = int_to_ptr.hbm [resolvable:$true] %s758_s14 }
 0x243   : > { %s3003_s29 = sshll.u32 %s1036_s10, 4  ;;  %s2153_s24 = sshra.s32 %s759_s14, 4  ;;  %s2154_s24 = int_to_ptr.hbm [resolvable:$true] %s2153_s24  ;;  %s783_s29 = int_to_ptr.vmem [resolvable:$true] %s3003_s29 }
 0x244   : > { %s2155_s15 = scalar_lea.hbm %s2154_s24, 1  ;;  %p2158_p13 = scmp.lt.s32.totalorder %s2154_s24, %s3127_s1 }
 0x245   : > { %p2156_p0 = scmp.ne.s32.totalorder %s2154_s24, %s2155_s15  ;;  %p2159_p1 = scmp.lt.s32.totalorder %s2754_s13, %s2155_s15 }
 0x247   : > { %p2160_p6 = por %p2159_p1, %p2158_p13 }
 0x249   : > { %p2161_p2 = pnand %p2160_p6, %p2156_p0 }
 0x24b   : > { %2164 = shalt.err (!%p2161_p2)  }
 0x24c   : > { %s2165_s4 = sshra.s32 %s761_s26, 4  ;;  %s2166_s4 = int_to_ptr.vmem [resolvable:$true] %s2165_s4 }
 0x24d   : > { %s2167_s23 = scalar_lea.vmem %s2166_s4, 1  ;;  %p2170_p5 = scmp.lt.s32.totalorder %s2166_s4, [#allocation2] }
 0x24e   : > { %p2168_p3 = scmp.ne.s32.totalorder %s2166_s4, %s2167_s23  ;;  %p2171_p7 = scmp.lt.s32.totalorder %s2760_s21, %s2167_s23 }
 0x250   : > { %p2172_p10 = por %p2171_p7, %p2170_p5 }
 0x252   : > { %p2173_p9 = pnand %p2172_p10, %p2168_p3 }
 0x254   : > { %2176 = shalt.err (!%p2173_p9)  }
 0x255   : > { %763 = dma.hbm_to_vmem [thread:$0]  %s759_s14, 16, %s761_s26, %s2749_s5 }
 0x256   : > { %p766_p11 = scmp.gt.s32.totalorder %s2991_s28, 0  ;;  %p1274_p12 = scmp.lt.s32.totalorder %s2991_s28, 1023 }
 0x257   : > { %s1040_s10 = scalar_lea.vmem %s2740_s12, 13 [#allocation2]  ;;  %p788_p0 = scmp.gt.s32.totalorder %s3001_s6, 0 }
 0x258   : > { %s3242_s28 = smov (!%p766_p11, %s2991_s28), 0  ;;  %s808_s9 = sadd.s32 14, %s2731_s22 }
 0x259   : > { %s3244_s28 = smov (!%p1274_p12, %s3242_s28), 1023  ;;  %p1280_p13 = scmp.lt.s32.totalorder %s3001_s6, 1023 }
 0x25a   : > { %s789_s30 = scalar_select %p788_p0, %s3001_s6, 0 }
 0x25b   : > { %s770_s24 = scalar_lea.hbm %s3127_s1, %s3244_s28  ;;  %s3023_s7 = sld [smem:[#allocation5 + %s808_s9]] }
 0x25c   : > { %s780_s15 = sshll.u32 %s770_s24, 4  ;;  %s3025_s26 = sshll.u32 %s1040_s10, 4  ;;  %s781_s15 = int_to_ptr.hbm [resolvable:$true] %s780_s15  ;;  %s805_s26 = int_to_ptr.vmem [resolvable:$true] %s3025_s26 }
 0x25d   : > { %s2177_s14 = sshra.s32 %s781_s15, 4  ;;  %s2178_s14 = int_to_ptr.hbm [resolvable:$true] %s2177_s14 }
 0x25e   : > { %s2179_s8 = scalar_lea.hbm %s2178_s14, 1  ;;  %p2182_p6 = scmp.lt.s32.totalorder %s2178_s14, %s3127_s1 }
 0x25f   : > { %p2180_p1 = scmp.ne.s32.totalorder %s2178_s14, %s2179_s8  ;;  %p2183_p2 = scmp.lt.s32.totalorder %s2754_s13, %s2179_s8 }
 0x261   : > { %p2184_p3 = por %p2183_p2, %p2182_p6 }
 0x263   : > { %p2185_p5 = pnand %p2184_p3, %p2180_p1 }
 0x265   : > { %2188 = shalt.err (!%p2185_p5)  }
 0x266   : > { %s2189_s28 = sshra.s32 %s783_s29, 4  ;;  %s2190_s28 = int_to_ptr.vmem [resolvable:$true] %s2189_s28 }
 0x267   : > { %s2191_s9 = scalar_lea.vmem %s2190_s28, 1  ;;  %p2194_p10 = scmp.lt.s32.totalorder %s2190_s28, [#allocation2] }
 0x268   : > { %p2192_p7 = scmp.ne.s32.totalorder %s2190_s28, %s2191_s9  ;;  %p2195_p9 = scmp.lt.s32.totalorder %s2760_s21, %s2191_s9 }
 0x26a   : > { %p2196_p11 = por %p2195_p9, %p2194_p10 }
 0x26c   : > { %p2197_p12 = pnand %p2196_p11, %p2192_p7 }
 0x26e   : > { %2200 = shalt.err (!%p2197_p12)  }
 0x26f   : > { %785 = dma.hbm_to_vmem [thread:$0]  %s781_s15, 16, %s783_s29, %s2749_s5 }
 0x270   : > { %s3246_s30 = smov (!%p1280_p13, %s789_s30), 1023  ;;  %s1044_s10 = scalar_lea.vmem %s2740_s12, 14 [#allocation2] }
 0x271   : > { %s792_s24 = scalar_lea.hbm %s3127_s1, %s3246_s30  ;;  %s830_s14 = sadd.s32 15, %s2731_s22 }
 0x272   : > { %s802_s8 = sshll.u32 %s792_s24, 4  ;;  %p810_p0 = scmp.gt.s32.totalorder %s3023_s7, 0  ;;  %s803_s8 = int_to_ptr.hbm [resolvable:$true] %s802_s8 }
 0x273   : > { %p1286_p1 = scmp.lt.s32.totalorder %s3023_s7, 1023  ;;  %s2201_s4 = sshra.s32 %s803_s8, 4  ;;  %s2202_s4 = int_to_ptr.hbm [resolvable:$true] %s2201_s4 }
 0x274   : > { %s2203_s23 = scalar_lea.hbm %s2202_s4, 1  ;;  %p2206_p2 = scmp.lt.s32.totalorder %s2202_s4, %s3127_s1 }
 0x275   : > { %p2204_p6 = scmp.ne.s32.totalorder %s2202_s4, %s2203_s23  ;;  %p2207_p13 = scmp.lt.s32.totalorder %s2754_s13, %s2203_s23 }
 0x277   : > { %p2208_p3 = por %p2207_p13, %p2206_p2 }
 0x279   : > { %p2209_p5 = pnand %p2208_p3, %p2204_p6 }
 0x27b   : > { %2212 = shalt.err (!%p2209_p5)  }
 0x27c   : > { %s2213_s6 = sshra.s32 %s805_s26, 4  ;;  %s2214_s6 = int_to_ptr.vmem [resolvable:$true] %s2213_s6 }
 0x27d   : > { %s2215_s22 = scalar_lea.vmem %s2214_s6, 1  ;;  %p2218_p10 = scmp.lt.s32.totalorder %s2214_s6, [#allocation2] }
 0x27e   : > { %p2216_p7 = scmp.ne.s32.totalorder %s2214_s6, %s2215_s22  ;;  %p2219_p9 = scmp.lt.s32.totalorder %s2760_s21, %s2215_s22 }
 0x280   : > { %p2220_p11 = por %p2219_p9, %p2218_p10 }
 0x282   : > { %p2221_p12 = pnand %p2220_p11, %p2216_p7 }
 0x284   : > { %2224 = shalt.err (!%p2221_p12)  }
 0x285   : > { %807 = dma.hbm_to_vmem [thread:$0]  %s803_s8, 16, %s805_s26, %s2749_s5 }
 0x286   : > { %s811_s29 = scalar_select %p810_p0, %s3023_s7, 0 }
 0x287   : > { %s826_s30 = sshll.u32 %s1044_s10, 4  ;;  %s3056_s15 = sld [smem:[#allocation5 + %s830_s14]]  ;;  %s827_s30 = int_to_ptr.vmem [resolvable:$true] %s826_s30 }
 0x288   : > { %s3248_s29 = smov (!%p1286_p1, %s811_s29), 1023  ;;  %s1048_s23 = scalar_lea.vmem %s2740_s12, 15 [#allocation2] }
 0x289   : > { %s814_s24 = scalar_lea.hbm %s3127_s1, %s3248_s29 }
 0x28a   : > { %s824_s4 = sshll.u32 %s814_s24, 4  ;;  %s825_s4 = int_to_ptr.hbm [resolvable:$true] %s824_s4 }
 0x28b   : > { %s2225_s28 = sshra.s32 %s825_s4, 4  ;;  %s2226_s28 = int_to_ptr.hbm [resolvable:$true] %s2225_s28 }
 0x28c   : > { %s2227_s9 = scalar_lea.hbm %s2226_s28, 1  ;;  %p2230_p0 = scmp.lt.s32.totalorder %s2226_s28, %s3127_s1 }
 0x28d   : > { %p2228_p6 = scmp.ne.s32.totalorder %s2226_s28, %s2227_s9  ;;  %p2231_p2 = scmp.lt.s32.totalorder %s2754_s13, %s2227_s9 }
 0x28f   : > { %p2232_p13 = por %p2231_p2, %p2230_p0 }
 0x291   : > { %p2233_p3 = pnand %p2232_p13, %p2228_p6 }
 0x293   : > { %2236 = shalt.err (!%p2233_p3)  }
 0x294   : > { %s2237_s7 = sshra.s32 %s827_s30, 4  ;;  %s2238_s7 = int_to_ptr.vmem [resolvable:$true] %s2237_s7 }
 0x295   : > { %s2239_s10 = scalar_lea.vmem %s2238_s7, 1  ;;  %p2242_p5 = scmp.lt.s32.totalorder %s2238_s7, [#allocation2] }
 0x296   : > { %p2240_p1 = scmp.ne.s32.totalorder %s2238_s7, %s2239_s10  ;;  %p2243_p7 = scmp.lt.s32.totalorder %s2760_s21, %s2239_s10 }
 0x298   : > { %p2244_p10 = por %p2243_p7, %p2242_p5 }
 0x29a   : > { %p2245_p9 = pnand %p2244_p10, %p2240_p1 }
 0x29c   : > { %2248 = shalt.err (!%p2245_p9)  }
 0x29d   : > { %829 = dma.hbm_to_vmem [thread:$0]  %s825_s4, 16, %s827_s30, %s2749_s5 }
 0x29e   : > { %p832_p11 = scmp.gt.s32.totalorder %s3056_s15, 0  ;;  %p1292_p12 = scmp.lt.s32.totalorder %s3056_s15, 1023 }
 0x29f   : > { %s848_s12 = sshll.u32 %s1048_s23, 4  ;;  %s849_s12 = int_to_ptr.vmem [resolvable:$true] %s848_s12 }
 0x2a0   : > { %s3250_s15 = smov (!%p832_p11, %s3056_s15), 0 }
 0x2a1   : > { %s3252_s15 = smov (!%p1292_p12, %s3250_s15), 1023 }
 0x2a2   : > { %s836_s22 = scalar_lea.hbm %s3127_s1, %s3252_s15 }
 0x2a3   : > { %s846_s29 = sshll.u32 %s836_s22, 4  ;;  %s847_s29 = int_to_ptr.hbm [resolvable:$true] %s846_s29 }
 0x2a4   : > { %s2249_s20 = sshra.s32 %s847_s29, 4  ;;  %s2250_s20 = int_to_ptr.hbm [resolvable:$true] %s2249_s20 }
 0x2a5   : > { %s2251_s2 = scalar_lea.hbm %s2250_s20, 1  ;;  %p2254_p0 = scmp.lt.s32.totalorder %s2250_s20, %s3127_s1 }
 0x2a6   : > { %p2252_p6 = scmp.ne.s32.totalorder %s2250_s20, %s2251_s2  ;;  %p2255_p2 = scmp.lt.s32.totalorder %s2754_s13, %s2251_s2 }
 0x2a8   : > { %p2256_p13 = por %p2255_p2, %p2254_p0 }
 0x2aa   : > { %p2257_p3 = pnand %p2256_p13, %p2252_p6 }
 0x2ac   : > { %2260 = shalt.err (!%p2257_p3)  }
 0x2ad   : > { %s2261_s30 = sshra.s32 %s849_s12, 4  ;;  %s2262_s30 = int_to_ptr.vmem [resolvable:$true] %s2261_s30 }
 0x2ae   : > { %s2263_s4 = scalar_lea.vmem %s2262_s30, 1  ;;  %p2266_p5 = scmp.lt.s32.totalorder %s2262_s30, [#allocation2] }
 0x2af   : > { %p2264_p1 = scmp.ne.s32.totalorder %s2262_s30, %s2263_s4  ;;  %p2267_p7 = scmp.lt.s32.totalorder %s2760_s21, %s2263_s4 }
 0x2b1   : > { %p2268_p10 = por %p2267_p7, %p2266_p5 }
 0x2b3   : > { %p2269_p9 = pnand %p2268_p10, %p2264_p1 }
 0x2b5   : > { %2272 = shalt.err (!%p2269_p9)  }
 0x2b6   : > { %851 = dma.hbm_to_vmem [thread:$0]  %s847_s29, 16, %s849_s12, %s2749_s5 }
 0x2b7 PF: > { %p852_p11 = scmp.lt.s32.totalorder %s2351_s19, 0  ;;  %s853_s13 = ssub.s32 0, %s2351_s19 }
 0x2b8   : > { %s1298_s15 = smin.u32 %s2351_s19, %s853_s13 }
 0x2b9   : > { %s855_s23 = sand.u32 1, %s1298_s15  }
 0x2ba   : > { %s856_s9 = ssub.s32 0, %s855_s23 }
 0x2bb   : > { %s3254_s9 = smov (!%p852_p11, %s856_s9), %s855_s23 }
 0x2bc   : > { %p1300_p12 = scmp.lt.s32.totalorder %s3254_s9, 0  ;;  %s862_s26 = sadd.s32 2, %s3254_s9 }
 0x2be   : > { %s3256_s26 = smov (!%p1300_p12, %s862_s26), %s3254_s9 }
 0x2bf   : > { %s864_s8 = scalar_lea.sflag [#allocation3], %s3256_s26 }
 0x2c0   : > { %2331 = dma.done.wait %s864_s8, 256 }
 0x2c1   : > { %2332 = vsyncadd %s864_s8, 4294967040  ;;  %s1301_s5 = sshll.u32 %s3256_s26, 4  ;;  %s1375_s21 = sshll.u32 %s2351_s19, 4  ;;  %v902_v1 = vld [vmem:[#allocation6] sm:$0xff]  ;;  %v903_v4 = vld [vmem:[#allocation6 + $0x8] sm:$0xff] }
 0x2c2   : > { %s922_s12 = scalar_lea.hbm %s3129_s3, %s1375_s21  ;;  %s923_s14 = sshll.u32 %s2468_s11, 4  ;;  %s924_s14 = int_to_ptr.vmem [resolvable:$true] %s923_s14 }
 0x2c3   : > { %s925_s6 = sshll.u32 %s922_s12, 4  ;;  %s899_s22 = scalar_lea.vmem [#allocation2], %s1301_s5  ;;  %s926_s6 = int_to_ptr.hbm [resolvable:$true] %s925_s6 }
 0x2c4   : > { %v900_v0 = vld [vmem:[%s899_s22] sm:$0xff]  ;;  %v901_v2 = vld [vmem:[%s899_s22 + $0x8] sm:$0xff]  ;;  %s3154_s29 = sand.u32 1, %s2343_s17   ;;  %s2287_s20 = sshra.s32 %s926_s6, 4  ;;  %s2288_s20 = int_to_ptr.hbm [resolvable:$true] %s2287_s20 }
 0x2c5   : > { %v904_v3 = vadd.f32 %v902_v1, %v900_v0  ;;  %v905_v5 = vadd.f32 %v903_v4, %v901_v2  ;;  %s909_s19 = scalar_lea.sflag [#allocation8], %s3154_s29  ;;  %s2289_s2 = scalar_lea.hbm %s2288_s20, 16 }
 0x2c6   : > { %p2290_p6 = scmp.ne.s32.totalorder %s2288_s20, %s2289_s2  ;;  %s2293_s30 = scalar_lea.hbm %s3129_s3, 32 }
 0x2c7   : > { %906 = vst [vmem:[%s2468_s11] sm:$0xff] %v904_v3  ;;  %p2294_p13 = scmp.lt.s32.totalorder %s2288_s20, %s3129_s3  ;;  %p2295_p3 = scmp.lt.s32.totalorder %s2293_s30, %s2289_s2 }
 0x2c8   : > { %907 = vst [vmem:[%s2468_s11 + $0x8] sm:$0xff] %v905_v5  ;;  %p2291_p0 = pnand %p2290_p6, %p2447_p4 }
 0x2c9   : > { %p2296_p1 = por %p2295_p3, %p2294_p13 }
 0x2ca   : > { %p2292_p2 = pneg %p2291_p0 }
 0x2cc   : > { %p2297_p5 = pnand %p2296_p1, %p2292_p2 }
 0x2ce   : > { %2300 = shalt.err (!%p2297_p5)
}
 0x2cf   : > { %s2382_s11 = smov 128   ;;  %s2383_s15 = smov 8  }
 0x2d0   : > { %1380 = dma.vmem_to_hbm [thread:$0]  (%p2447_p4), %s924_s14, 256, %s926_s6, %s909_s19, %s2382_s11, %s2382_s11, %s2383_s15  }
 0x2d1 PF: > { %p1392_p7 = scmp.ge.s32.totalorder %s2359_s0, 2  ;;  %s940_s23 = sand.u32 1, %s2339_s16  }
 0x2d2   : > { %s941_s9 = scalar_lea.sflag [#allocation8], %s940_s23 }
 0x2d3   : > { %p1387_p10 = pnand %p1392_p7, %p2454_p8 }
 0x2d5   : > { %p1388_p9 = pneg %p1387_p10 }
 0x2d7   : > { %2334 = dma.done.wait (%p1388_p9), %s941_s9, 256  }
 0x2d8   : > { %2336 = vsyncadd (%p1388_p9), %s941_s9, 4294967040  ;;  %s25_s0 = sadd.s32 1, %s2359_s0   ;;  %s3155_s26 = sld [smem:[#allocation82_spill]] }
 0x2d9   : > { %p22_p11 = scmp.ge.s32.totalorder %s25_s0, 4   ;;  %s3156_s19 = sld [smem:[#allocation80_spill]] }
 0x2da   : > { %s3157_s20 = sld [smem:[#allocation81_spill]]  ;;  %s3158_s16 = smov %s2343_s17 }
 0x2db   : > { %s3159_s17 = smov %s2347_s18  ;;  %24 = sbr.rel (!%p22_p11) target bundleno = 11 (0xb), region = 264 }
 0x2de   : > { %s3160_s18 = smov %s3155_s26 }
 0x2e0   :  { %947 = vsyncpa [#allocation7], 1 }
 0x2e1   :  { %949 = vsyncpa [#allocation7 + $0x1], 1 }
 0x2e2   :  { %950 = vsyncpa [#allocation8], 1 }
 0x2e3   :  { %952 = vsyncpa [#allocation8 + $0x1], 1 }
 0x2e4   :  { %953 = vsyncmov [#allocation3] }
 0x2e7   :  { %s954_s25 = vpop.sfrf %953 }
 0x2e8   :  { %p1307_p4 = scmp.ne.s32.totalorder %s954_s25, 0 }
 0x2ea   :  { %958 = shalt.err (%p1307_p4)  }
 0x2eb   :  { %960 = vsyncmov [#allocation3 + $0x1] }
 0x2ee   :  { %s961_s27 = vpop.sfrf %960 }
 0x2ef   :  { %p1308_p8 = scmp.ne.s32.totalorder %s961_s27, 0 }
 0x2f1   :  { %965 = shalt.err (%p1308_p8)  }

</bundles_post_ra>
